<compile_context>
chip_gen: v6e
topology: v6e:2x2x1
jax: 0.10.0
libtpu: 0.0.40
codegen_flags: <defaults>
</compile_context>

<pallas_src>
import jax
import jax.numpy as jnp
from jax import lax
from jax.experimental import pallas as pl
from jax.experimental.pallas import tpu as pltpu

EPS = 1e-12


def bert_embeddings_kernel(ids_ref,      # SMEM  (M,)    int32  (scalar prefetch)
                           tt_ref,       # VMEM  (tm, 1) int32  token-type ids
                           word_hbm,     # ANY   (V, H)         word table (HBM)
                           pos_ref,      # VMEM  (S, H)         resident position slab
                           tok_ref,      # VMEM  (T, H)         token-type table
                           gamma_ref,    # VMEM  (1, H)
                           beta_ref,     # VMEM  (1, H)
                           out_ref,      # VMEM  (tm, H)
                           wbuf,         # VMEM  (2, tm, H) scratch (gathered word rows)
                           dma_sem):     # DMA semaphores, shape (2,) -- one per slot
    i = pl.program_id(0)
    n = pl.num_programs(0)
    tm, H = out_ref.shape
    n_pos_blocks = pos_ref.shape[0] // tm
    T = tok_ref.shape[0]
    slot = i % 2

    # ---- word-row gather: issue tm per-row HBM->VMEM DMAs into a given slot ----
    def start_gather(tile_idx, slot_idx):
        base = tile_idx * tm

        def _start(j, carry):
            tid = ids_ref[base + j]
            pltpu.make_async_copy(word_hbm.at[tid], wbuf.at[slot_idx, j],
                                  dma_sem.at[slot_idx]).start()
            return carry

        # Unrolled so the single vector-misc slot (descriptor pushes) and the two
        # scalar slots (SMEM id load + address math) co-issue.
        lax.fori_loop(0, tm, _start, 0, unroll=8)

    # Prime the very first tile (grid axis is "arbitrary" => strictly sequential,
    # so i == 0 really is the first step executed).
    @pl.when(i == 0)
    def _prime():
        start_gather(i, slot)

    # Prefetch the next tile's rows into the other slot; its wait happens at step i+1.
    @pl.when(i + 1 < n)
    def _prefetch_next():
        start_gather(i + 1, 1 - slot)

    # ---- token-type + position embeddings while the current gather is in flight ----
    pos_off = pl.multiple_of((i % n_pos_blocks) * tm, tm)
    rest = pos_ref[pl.ds(pos_off, tm), :].astype(jnp.float32)        # (tm, H)
    tok_tab = tok_ref[...].astype(jnp.float32)                        # (T, H)
    if T == 2:
        ttf = tt_ref[...].astype(jnp.float32)                         # (tm, 1)
        rest = rest + tok_tab[0:1, :] + ttf * (tok_tab[1:2, :] - tok_tab[0:1, :])
    else:
        tt = tt_ref[...]                                              # (tm, 1) int32
        for t in range(T):
            rest = rest + (tt == t).astype(jnp.float32) * tok_tab[t:t + 1, :]

    # ---- single aggregate wait for this tile's tm row copies --------------------
    # The DMA semaphore is byte-counted and every row copy moves H*itemsize bytes,
    # so one (tm, H)-sized descriptor wait matches the sum of the tm row copies.
    pltpu.make_async_copy(word_hbm.at[pl.ds(0, tm)], wbuf.at[slot],
                          dma_sem.at[slot]).wait()

    # ---- sum + LayerNorm (f32 stats, eps = 1e-12) --------------------------------
    x = wbuf[slot].astype(jnp.float32) + rest

    inv_h = 1.0 / H
    s1 = jnp.sum(x, axis=-1, keepdims=True)
    s2 = jnp.sum(x * x, axis=-1, keepdims=True)
    mu = s1 * inv_h
    var = jnp.maximum(s2 * inv_h - mu * mu, 0.0)   # clamp: f32 cancellation guard
    inv = lax.rsqrt(var + EPS)
    y = (x - mu) * inv * gamma_ref[...].astype(jnp.float32) \
        + beta_ref[...].astype(jnp.float32)

    # Dropout is identity in eval mode.
    out_ref[...] = y.astype(out_ref.dtype)


def _pick_tm(seq_len, desired=512):
    """Largest multiple of 8 that divides seq_len and is <= desired."""
    best = 8
    t = 8
    while t <= min(seq_len, desired):
        if seq_len % t == 0:
            best = t
        t += 8
    return best


def bert_embeddings(input_ids, token_type_ids, word_emb, pos_emb, tok_emb,
                    gamma, beta, *, tm=None):
    """input_ids, token_type_ids: [B, S] int; word_emb: [V, H];
    pos_emb: [P, H] (P >= S); tok_emb: [T, H]; gamma, beta: [H].
    Returns [B, S, H]."""
    B, S = input_ids.shape
    V, H = word_emb.shape
    T = tok_emb.shape[0]
    assert S % 8 == 0, "sequence length must be a multiple of 8"
    assert H % 128 == 0, "hidden size must be a multiple of 128 (lane-dense stores)"
    assert pos_emb.shape[0] >= S

    if token_type_ids is None:
        token_type_ids = jnp.zeros_like(input_ids)

    if tm is None:
        tm = _pick_tm(S)
    assert S % tm == 0 and tm % 8 == 0
    assert V >= tm, "aggregate-wait descriptor slices the first tm table rows"
    M = B * S
    # 1D int32 scalar-prefetch pads to next_pow2(4*M) bytes in SMEM; keep it sane.
    assert M <= (1 << 18), "ids too large for SMEM scalar prefetch; chunk per-tile"

    ids_flat = input_ids.reshape(M).astype(jnp.int32)          # -> SMEM prefetch
    tt2d = token_type_ids.reshape(M, 1).astype(jnp.int32)
    pos_s = pos_emb[:S]                                         # resident slab
    gamma2d = gamma.reshape(1, H)
    beta2d = beta.reshape(1, H)

    itemsize = jnp.dtype(word_emb.dtype).itemsize
    est = (2 * tm * H * itemsize          # output, double-buffered
           + 2 * tm * H * itemsize        # wbuf (2 slots)
           + 2 * S * H * itemsize         # resident position slab (+spare buffer)
           + 2 * T * H * itemsize
           + 4 * H * 4                    # gamma/beta
           + 4 * tm * 4)                  # token-type ids
    vmem_limit = int(min(64 << 20, max(32 << 20, 2 * est)))

    out = pl.pallas_call(
        bert_embeddings_kernel,
        out_shape=jax.ShapeDtypeStruct((M, H), word_emb.dtype),
        grid_spec=pltpu.PrefetchScalarGridSpec(
            num_scalar_prefetch=1,
            grid=(M // tm,),
            in_specs=[
                pl.BlockSpec((tm, 1), lambda i, ids: (i, 0)),      # token-type ids
                pl.BlockSpec(memory_space=pl.ANY),                 # word table (HBM)
                pl.BlockSpec((S, H), lambda i, ids: (0, 0)),       # resident positions
                pl.BlockSpec((T, H), lambda i, ids: (0, 0)),       # token-type table
                pl.BlockSpec((1, H), lambda i, ids: (0, 0)),       # gamma
                pl.BlockSpec((1, H), lambda i, ids: (0, 0)),       # beta
            ],
            out_specs=pl.BlockSpec((tm, H), lambda i, ids: (i, 0)),
            scratch_shapes=[
                pltpu.VMEM((2, tm, H), word_emb.dtype),            # double-buffered rows
                pltpu.SemaphoreType.DMA((2,)),                     # per-slot semaphores
            ],
        ),
        compiler_params=pltpu.CompilerParams(
            # Sequential grid: required by the prime-at-i==0 / prefetch-i+1 scheme.
            dimension_semantics=("arbitrary",),
            vmem_limit_bytes=vmem_limit),
    )(ids_flat, tt2d, word_emb, pos_s, tok_emb, gamma2d, beta2d)

    return out.reshape(B, S, H)


def bert_embeddings_ref(input_ids, token_type_ids, word_emb, pos_emb, tok_emb,
                        gamma, beta):
    B, S = input_ids.shape
    we = word_emb[input_ids]                                   # (B, S, H)
    pe = pos_emb[jnp.arange(S)][None, :, :]                    # (1, S, H)
    te = tok_emb[token_type_ids]                               # (B, S, H)
    x = we + pe + te
    mu = jnp.mean(x, axis=-1, keepdims=True)
    var = jnp.mean((x - mu) ** 2, axis=-1, keepdims=True)
    return gamma * (x - mu) / jnp.sqrt(var + EPS) + beta


if __name__ == "__main__":
    # Small shapes; H a multiple of 128 so output stores are lane-dense.
    B, S, H = 2, 8, 128
    V, P, T = 96, 16, 2      # vocab, max positions, type vocab

    key = jax.random.PRNGKey(0)
    k1, k2, k3, k4, k5 = jax.random.split(key, 5)

    input_ids = jax.random.randint(k1, (B, S), 0, V, dtype=jnp.int32)
    token_type_ids = jax.random.randint(k2, (B, S), 0, T, dtype=jnp.int32)

    word_emb = jax.random.normal(k3, (V, H), dtype=jnp.float32)
    pos_emb = jax.random.normal(k4, (P, H), dtype=jnp.float32)
    tok_emb = jax.random.normal(k5, (T, H), dtype=jnp.float32)
    gamma = jnp.ones((H,), dtype=jnp.float32)
    beta = jnp.zeros((H,), dtype=jnp.float32)

    out = bert_embeddings(input_ids, token_type_ids, word_emb, pos_emb, tok_emb,
                          gamma, beta)
    out = jax.block_until_ready(out)

    ref = bert_embeddings_ref(input_ids, token_type_ids, word_emb, pos_emb,
                              tok_emb, gamma, beta)
    assert out.shape == (B, S, H)
    err = jnp.max(jnp.abs(out - ref))
    assert jnp.allclose(out, ref, atol=1e-4, rtol=1e-4), f"max err {err}"

    print("KERNEL_OK")
</pallas_src>

<mosaic_0001>
module attributes {stable_mosaic.version = 11 : i64} {
  func.func @bert_embeddings_kernel(%arg0: i32, %arg1: memref<16xi32, #tpu.memory_space<smem>>, %arg2: memref<8x1xi32, #tpu.memory_space<vmem>>, %arg3: memref<96x128xf32, #tpu.memory_space<any>>, %arg4: memref<8x128xf32, #tpu.memory_space<vmem>>, %arg5: memref<2x128xf32, #tpu.memory_space<vmem>>, %arg6: memref<1x128xf32, #tpu.memory_space<vmem>>, %arg7: memref<1x128xf32, #tpu.memory_space<vmem>>, %arg8: memref<8x128xf32, #tpu.memory_space<vmem>>, %arg9: memref<2x8x128xf32, #tpu.memory_space<vmem>>, %arg10: memref<2x!tpu.dma_semaphore, #tpu.memory_space<semaphore_mem>>) attributes {dimension_semantics = [#tpu.dimension_semantics<arbitrary>], iteration_bounds = array<i64: 2>, scalar_prefetch = 1 : i64, scratch_operands = 2 : i64, tpu.core_type = #tpu.core_type<tc>, window_params = [{transform_indices = @transform_0, window_bounds = array<i64: 8, 1>}, {}, {pipeline_mode = #tpu.pipeline_mode<synchronous>, transform_indices = @transform_2, window_bounds = array<i64: 8, 128>}, {pipeline_mode = #tpu.pipeline_mode<synchronous>, transform_indices = @transform_3, window_bounds = array<i64: 2, 128>}, {pipeline_mode = #tpu.pipeline_mode<synchronous>, transform_indices = @transform_4, window_bounds = array<i64: 1, 128>}, {pipeline_mode = #tpu.pipeline_mode<synchronous>, transform_indices = @transform_5, window_bounds = array<i64: 1, 128>}, {transform_indices = @transform_6, window_bounds = array<i64: 8, 128>}]} {
    %c2_i32 = arith.constant 2 : i32
    %c0_i32 = arith.constant 0 : i32
    %0 = arith.cmpi eq, %c2_i32, %c0_i32 : i32
    %c1_i32 = arith.constant 1 : i32
    %1 = arith.select %0, %c1_i32, %c2_i32 : i32
    %2 = arith.remsi %arg0, %1 : i32
    %c0_i32_0 = arith.constant 0 : i32
    %3 = arith.cmpi ne, %2, %c0_i32_0 : i32
    %c0_i32_1 = arith.constant 0 : i32
    %4 = arith.cmpi slt, %2, %c0_i32_1 : i32
    %c0_i32_2 = arith.constant 0 : i32
    %5 = arith.cmpi slt, %1, %c0_i32_2 : i32
    %6 = arith.xori %4, %5 : i1
    %7 = arith.andi %6, %3 : i1
    %8 = arith.addi %2, %1 : i32
    %9 = arith.select %7, %8, %2 : i32
    %c0_i32_3 = arith.constant 0 : i32
    %10 = arith.cmpi eq, %arg0, %c0_i32_3 : i32
    %11 = arith.extui %10 : i1 to i32
    %c0_i32_4 = arith.constant 0 : i32
    %12 = arith.cmpi ne, %11, %c0_i32_4 : i32
    scf.if %12 {
      %c8_i32_35 = arith.constant 8 : i32
      %80 = arith.muli %arg0, %c8_i32_35 : i32
      %c0_i32_36 = arith.constant 0 : i32
      %81 = arith.addi %80, %c0_i32_36 : i32
      %82 = arith.index_cast %81 : i32 to index
      %83 = memref.load %arg1[%82] : memref<16xi32, #tpu.memory_space<smem>>
      %c0_i32_37 = arith.constant 0 : i32
      %84 = tpu.memref_slice %arg3[%83, %c0_i32_37] : memref<96x128xf32, #tpu.memory_space<any>> -> memref<1x128xf32, #tpu.memory_space<any>>
      %85 = tpu.memref_squeeze %84 : memref<1x128xf32, #tpu.memory_space<any>> -> memref<128xf32, #tpu.memory_space<any>>
      %c0_i32_38 = arith.constant 0 : i32
      %86 = tpu.memref_slice %arg9[%9, %c0_i32_36, %c0_i32_38] : memref<2x8x128xf32, #tpu.memory_space<vmem>> -> memref<1x1x128xf32, #tpu.memory_space<vmem>>
      %87 = tpu.memref_squeeze %86 : memref<1x1x128xf32, #tpu.memory_space<vmem>> -> memref<128xf32, #tpu.memory_space<vmem>>
      %88 = tpu.memref_slice %arg10[%9] : memref<2x!tpu.dma_semaphore, #tpu.memory_space<semaphore_mem>> -> memref<1x!tpu.dma_semaphore, #tpu.memory_space<semaphore_mem>>
      %89 = tpu.memref_squeeze %88 : memref<1x!tpu.dma_semaphore, #tpu.memory_space<semaphore_mem>> -> memref<!tpu.dma_semaphore, #tpu.memory_space<semaphore_mem>>
      tpu.enqueue_dma source(%85 : memref<128xf32, #tpu.memory_space<any>>) target(%87 : memref<128xf32, #tpu.memory_space<vmem>>) target_semaphore(%89 : memref<!tpu.dma_semaphore, #tpu.memory_space<semaphore_mem>>)
      %c1_i32_39 = arith.constant 1 : i32
      %90 = arith.addi %80, %c1_i32_39 : i32
      %91 = arith.index_cast %90 : i32 to index
      %92 = memref.load %arg1[%91] : memref<16xi32, #tpu.memory_space<smem>>
      %c0_i32_40 = arith.constant 0 : i32
      %93 = tpu.memref_slice %arg3[%92, %c0_i32_40] : memref<96x128xf32, #tpu.memory_space<any>> -> memref<1x128xf32, #tpu.memory_space<any>>
      %94 = tpu.memref_squeeze %93 : memref<1x128xf32, #tpu.memory_space<any>> -> memref<128xf32, #tpu.memory_space<any>>
      %c0_i32_41 = arith.constant 0 : i32
      %95 = tpu.memref_slice %arg9[%9, %c1_i32_39, %c0_i32_41] : memref<2x8x128xf32, #tpu.memory_space<vmem>> -> memref<1x1x128xf32, #tpu.memory_space<vmem>>
      %96 = tpu.memref_squeeze %95 : memref<1x1x128xf32, #tpu.memory_space<vmem>> -> memref<128xf32, #tpu.memory_space<vmem>>
      %97 = tpu.memref_slice %arg10[%9] : memref<2x!tpu.dma_semaphore, #tpu.memory_space<semaphore_mem>> -> memref<1x!tpu.dma_semaphore, #tpu.memory_space<semaphore_mem>>
      %98 = tpu.memref_squeeze %97 : memref<1x!tpu.dma_semaphore, #tpu.memory_space<semaphore_mem>> -> memref<!tpu.dma_semaphore, #tpu.memory_space<semaphore_mem>>
      tpu.enqueue_dma source(%94 : memref<128xf32, #tpu.memory_space<any>>) target(%96 : memref<128xf32, #tpu.memory_space<vmem>>) target_semaphore(%98 : memref<!tpu.dma_semaphore, #tpu.memory_space<semaphore_mem>>)
      %c2_i32_42 = arith.constant 2 : i32
      %99 = arith.addi %80, %c2_i32_42 : i32
      %100 = arith.index_cast %99 : i32 to index
      %101 = memref.load %arg1[%100] : memref<16xi32, #tpu.memory_space<smem>>
      %c0_i32_43 = arith.constant 0 : i32
      %102 = tpu.memref_slice %arg3[%101, %c0_i32_43] : memref<96x128xf32, #tpu.memory_space<any>> -> memref<1x128xf32, #tpu.memory_space<any>>
      %103 = tpu.memref_squeeze %102 : memref<1x128xf32, #tpu.memory_space<any>> -> memref<128xf32, #tpu.memory_space<any>>
      %c0_i32_44 = arith.constant 0 : i32
      %104 = tpu.memref_slice %arg9[%9, %c2_i32_42, %c0_i32_44] : memref<2x8x128xf32, #tpu.memory_space<vmem>> -> memref<1x1x128xf32, #tpu.memory_space<vmem>>
      %105 = tpu.memref_squeeze %104 : memref<1x1x128xf32, #tpu.memory_space<vmem>> -> memref<128xf32, #tpu.memory_space<vmem>>
      %106 = tpu.memref_slice %arg10[%9] : memref<2x!tpu.dma_semaphore, #tpu.memory_space<semaphore_mem>> -> memref<1x!tpu.dma_semaphore, #tpu.memory_space<semaphore_mem>>
      %107 = tpu.memref_squeeze %106 : memref<1x!tpu.dma_semaphore, #tpu.memory_space<semaphore_mem>> -> memref<!tpu.dma_semaphore, #tpu.memory_space<semaphore_mem>>
      tpu.enqueue_dma source(%103 : memref<128xf32, #tpu.memory_space<any>>) target(%105 : memref<128xf32, #tpu.memory_space<vmem>>) target_semaphore(%107 : memref<!tpu.dma_semaphore, #tpu.memory_space<semaphore_mem>>)
      %c3_i32 = arith.constant 3 : i32
      %108 = arith.addi %80, %c3_i32 : i32
      %109 = arith.index_cast %108 : i32 to index
      %110 = memref.load %arg1[%109] : memref<16xi32, #tpu.memory_space<smem>>
      %c0_i32_45 = arith.constant 0 : i32
      %111 = tpu.memref_slice %arg3[%110, %c0_i32_45] : memref<96x128xf32, #tpu.memory_space<any>> -> memref<1x128xf32, #tpu.memory_space<any>>
      %112 = tpu.memref_squeeze %111 : memref<1x128xf32, #tpu.memory_space<any>> -> memref<128xf32, #tpu.memory_space<any>>
      %c0_i32_46 = arith.constant 0 : i32
      %113 = tpu.memref_slice %arg9[%9, %c3_i32, %c0_i32_46] : memref<2x8x128xf32, #tpu.memory_space<vmem>> -> memref<1x1x128xf32, #tpu.memory_space<vmem>>
      %114 = tpu.memref_squeeze %113 : memref<1x1x128xf32, #tpu.memory_space<vmem>> -> memref<128xf32, #tpu.memory_space<vmem>>
      %115 = tpu.memref_slice %arg10[%9] : memref<2x!tpu.dma_semaphore, #tpu.memory_space<semaphore_mem>> -> memref<1x!tpu.dma_semaphore, #tpu.memory_space<semaphore_mem>>
      %116 = tpu.memref_squeeze %115 : memref<1x!tpu.dma_semaphore, #tpu.memory_space<semaphore_mem>> -> memref<!tpu.dma_semaphore, #tpu.memory_space<semaphore_mem>>
      tpu.enqueue_dma source(%112 : memref<128xf32, #tpu.memory_space<any>>) target(%114 : memref<128xf32, #tpu.memory_space<vmem>>) target_semaphore(%116 : memref<!tpu.dma_semaphore, #tpu.memory_space<semaphore_mem>>)
      %c4_i32 = arith.constant 4 : i32
      %117 = arith.addi %80, %c4_i32 : i32
      %118 = arith.index_cast %117 : i32 to index
      %119 = memref.load %arg1[%118] : memref<16xi32, #tpu.memory_space<smem>>
      %c0_i32_47 = arith.constant 0 : i32
      %120 = tpu.memref_slice %arg3[%119, %c0_i32_47] : memref<96x128xf32, #tpu.memory_space<any>> -> memref<1x128xf32, #tpu.memory_space<any>>
      %121 = tpu.memref_squeeze %120 : memref<1x128xf32, #tpu.memory_space<any>> -> memref<128xf32, #tpu.memory_space<any>>
      %c0_i32_48 = arith.constant 0 : i32
      %122 = tpu.memref_slice %arg9[%9, %c4_i32, %c0_i32_48] : memref<2x8x128xf32, #tpu.memory_space<vmem>> -> memref<1x1x128xf32, #tpu.memory_space<vmem>>
      %123 = tpu.memref_squeeze %122 : memref<1x1x128xf32, #tpu.memory_space<vmem>> -> memref<128xf32, #tpu.memory_space<vmem>>
      %124 = tpu.memref_slice %arg10[%9] : memref<2x!tpu.dma_semaphore, #tpu.memory_space<semaphore_mem>> -> memref<1x!tpu.dma_semaphore, #tpu.memory_space<semaphore_mem>>
      %125 = tpu.memref_squeeze %124 : memref<1x!tpu.dma_semaphore, #tpu.memory_space<semaphore_mem>> -> memref<!tpu.dma_semaphore, #tpu.memory_space<semaphore_mem>>
      tpu.enqueue_dma source(%121 : memref<128xf32, #tpu.memory_space<any>>) target(%123 : memref<128xf32, #tpu.memory_space<vmem>>) target_semaphore(%125 : memref<!tpu.dma_semaphore, #tpu.memory_space<semaphore_mem>>)
      %c5_i32 = arith.constant 5 : i32
      %126 = arith.addi %80, %c5_i32 : i32
      %127 = arith.index_cast %126 : i32 to index
      %128 = memref.load %arg1[%127] : memref<16xi32, #tpu.memory_space<smem>>
      %c0_i32_49 = arith.constant 0 : i32
      %129 = tpu.memref_slice %arg3[%128, %c0_i32_49] : memref<96x128xf32, #tpu.memory_space<any>> -> memref<1x128xf32, #tpu.memory_space<any>>
      %130 = tpu.memref_squeeze %129 : memref<1x128xf32, #tpu.memory_space<any>> -> memref<128xf32, #tpu.memory_space<any>>
      %c0_i32_50 = arith.constant 0 : i32
      %131 = tpu.memref_slice %arg9[%9, %c5_i32, %c0_i32_50] : memref<2x8x128xf32, #tpu.memory_space<vmem>> -> memref<1x1x128xf32, #tpu.memory_space<vmem>>
      %132 = tpu.memref_squeeze %131 : memref<1x1x128xf32, #tpu.memory_space<vmem>> -> memref<128xf32, #tpu.memory_space<vmem>>
      %133 = tpu.memref_slice %arg10[%9] : memref<2x!tpu.dma_semaphore, #tpu.memory_space<semaphore_mem>> -> memref<1x!tpu.dma_semaphore, #tpu.memory_space<semaphore_mem>>
      %134 = tpu.memref_squeeze %133 : memref<1x!tpu.dma_semaphore, #tpu.memory_space<semaphore_mem>> -> memref<!tpu.dma_semaphore, #tpu.memory_space<semaphore_mem>>
      tpu.enqueue_dma source(%130 : memref<128xf32, #tpu.memory_space<any>>) target(%132 : memref<128xf32, #tpu.memory_space<vmem>>) target_semaphore(%134 : memref<!tpu.dma_semaphore, #tpu.memory_space<semaphore_mem>>)
      %c6_i32 = arith.constant 6 : i32
      %135 = arith.addi %80, %c6_i32 : i32
      %136 = arith.index_cast %135 : i32 to index
      %137 = memref.load %arg1[%136] : memref<16xi32, #tpu.memory_space<smem>>
      %c0_i32_51 = arith.constant 0 : i32
      %138 = tpu.memref_slice %arg3[%137, %c0_i32_51] : memref<96x128xf32, #tpu.memory_space<any>> -> memref<1x128xf32, #tpu.memory_space<any>>
      %139 = tpu.memref_squeeze %138 : memref<1x128xf32, #tpu.memory_space<any>> -> memref<128xf32, #tpu.memory_space<any>>
      %c0_i32_52 = arith.constant 0 : i32
      %140 = tpu.memref_slice %arg9[%9, %c6_i32, %c0_i32_52] : memref<2x8x128xf32, #tpu.memory_space<vmem>> -> memref<1x1x128xf32, #tpu.memory_space<vmem>>
      %141 = tpu.memref_squeeze %140 : memref<1x1x128xf32, #tpu.memory_space<vmem>> -> memref<128xf32, #tpu.memory_space<vmem>>
      %142 = tpu.memref_slice %arg10[%9] : memref<2x!tpu.dma_semaphore, #tpu.memory_space<semaphore_mem>> -> memref<1x!tpu.dma_semaphore, #tpu.memory_space<semaphore_mem>>
      %143 = tpu.memref_squeeze %142 : memref<1x!tpu.dma_semaphore, #tpu.memory_space<semaphore_mem>> -> memref<!tpu.dma_semaphore, #tpu.memory_space<semaphore_mem>>
      tpu.enqueue_dma source(%139 : memref<128xf32, #tpu.memory_space<any>>) target(%141 : memref<128xf32, #tpu.memory_space<vmem>>) target_semaphore(%143 : memref<!tpu.dma_semaphore, #tpu.memory_space<semaphore_mem>>)
      %c7_i32 = arith.constant 7 : i32
      %144 = arith.addi %80, %c7_i32 : i32
      %145 = arith.index_cast %144 : i32 to index
      %146 = memref.load %arg1[%145] : memref<16xi32, #tpu.memory_space<smem>>
      %c0_i32_53 = arith.constant 0 : i32
      %147 = tpu.memref_slice %arg3[%146, %c0_i32_53] : memref<96x128xf32, #tpu.memory_space<any>> -> memref<1x128xf32, #tpu.memory_space<any>>
      %148 = tpu.memref_squeeze %147 : memref<1x128xf32, #tpu.memory_space<any>> -> memref<128xf32, #tpu.memory_space<any>>
      %c0_i32_54 = arith.constant 0 : i32
      %149 = tpu.memref_slice %arg9[%9, %c7_i32, %c0_i32_54] : memref<2x8x128xf32, #tpu.memory_space<vmem>> -> memref<1x1x128xf32, #tpu.memory_space<vmem>>
      %150 = tpu.memref_squeeze %149 : memref<1x1x128xf32, #tpu.memory_space<vmem>> -> memref<128xf32, #tpu.memory_space<vmem>>
      %151 = tpu.memref_slice %arg10[%9] : memref<2x!tpu.dma_semaphore, #tpu.memory_space<semaphore_mem>> -> memref<1x!tpu.dma_semaphore, #tpu.memory_space<semaphore_mem>>
      %152 = tpu.memref_squeeze %151 : memref<1x!tpu.dma_semaphore, #tpu.memory_space<semaphore_mem>> -> memref<!tpu.dma_semaphore, #tpu.memory_space<semaphore_mem>>
      tpu.enqueue_dma source(%148 : memref<128xf32, #tpu.memory_space<any>>) target(%150 : memref<128xf32, #tpu.memory_space<vmem>>) target_semaphore(%152 : memref<!tpu.dma_semaphore, #tpu.memory_space<semaphore_mem>>)
      %c8_i32_55 = arith.constant 8 : i32
    } else {
    }
    %c1_i32_5 = arith.constant 1 : i32
    %13 = arith.addi %arg0, %c1_i32_5 : i32
    %c2_i32_6 = arith.constant 2 : i32
    %14 = arith.cmpi slt, %13, %c2_i32_6 : i32
    %15 = arith.extui %14 : i1 to i32
    %c0_i32_7 = arith.constant 0 : i32
    %16 = arith.cmpi ne, %15, %c0_i32_7 : i32
    scf.if %16 {
      %c1_i32_35 = arith.constant 1 : i32
      %80 = arith.addi %arg0, %c1_i32_35 : i32
      %c1_i32_36 = arith.constant 1 : i32
      %81 = arith.subi %c1_i32_36, %9 : i32
      %c8_i32_37 = arith.constant 8 : i32
      %82 = arith.muli %80, %c8_i32_37 : i32
      %c0_i32_38 = arith.constant 0 : i32
      %83 = arith.addi %82, %c0_i32_38 : i32
      %84 = arith.index_cast %83 : i32 to index
      %85 = memref.load %arg1[%84] : memref<16xi32, #tpu.memory_space<smem>>
      %c0_i32_39 = arith.constant 0 : i32
      %86 = tpu.memref_slice %arg3[%85, %c0_i32_39] : memref<96x128xf32, #tpu.memory_space<any>> -> memref<1x128xf32, #tpu.memory_space<any>>
      %87 = tpu.memref_squeeze %86 : memref<1x128xf32, #tpu.memory_space<any>> -> memref<128xf32, #tpu.memory_space<any>>
      %c0_i32_40 = arith.constant 0 : i32
      %88 = tpu.memref_slice %arg9[%81, %c0_i32_38, %c0_i32_40] : memref<2x8x128xf32, #tpu.memory_space<vmem>> -> memref<1x1x128xf32, #tpu.memory_space<vmem>>
      %89 = tpu.memref_squeeze %88 : memref<1x1x128xf32, #tpu.memory_space<vmem>> -> memref<128xf32, #tpu.memory_space<vmem>>
      %90 = tpu.memref_slice %arg10[%81] : memref<2x!tpu.dma_semaphore, #tpu.memory_space<semaphore_mem>> -> memref<1x!tpu.dma_semaphore, #tpu.memory_space<semaphore_mem>>
      %91 = tpu.memref_squeeze %90 : memref<1x!tpu.dma_semaphore, #tpu.memory_space<semaphore_mem>> -> memref<!tpu.dma_semaphore, #tpu.memory_space<semaphore_mem>>
      tpu.enqueue_dma source(%87 : memref<128xf32, #tpu.memory_space<any>>) target(%89 : memref<128xf32, #tpu.memory_space<vmem>>) target_semaphore(%91 : memref<!tpu.dma_semaphore, #tpu.memory_space<semaphore_mem>>)
      %c1_i32_41 = arith.constant 1 : i32
      %92 = arith.addi %82, %c1_i32_41 : i32
      %93 = arith.index_cast %92 : i32 to index
      %94 = memref.load %arg1[%93] : memref<16xi32, #tpu.memory_space<smem>>
      %c0_i32_42 = arith.constant 0 : i32
      %95 = tpu.memref_slice %arg3[%94, %c0_i32_42] : memref<96x128xf32, #tpu.memory_space<any>> -> memref<1x128xf32, #tpu.memory_space<any>>
      %96 = tpu.memref_squeeze %95 : memref<1x128xf32, #tpu.memory_space<any>> -> memref<128xf32, #tpu.memory_space<any>>
      %c0_i32_43 = arith.constant 0 : i32
      %97 = tpu.memref_slice %arg9[%81, %c1_i32_41, %c0_i32_43] : memref<2x8x128xf32, #tpu.memory_space<vmem>> -> memref<1x1x128xf32, #tpu.memory_space<vmem>>
      %98 = tpu.memref_squeeze %97 : memref<1x1x128xf32, #tpu.memory_space<vmem>> -> memref<128xf32, #tpu.memory_space<vmem>>
      %99 = tpu.memref_slice %arg10[%81] : memref<2x!tpu.dma_semaphore, #tpu.memory_space<semaphore_mem>> -> memref<1x!tpu.dma_semaphore, #tpu.memory_space<semaphore_mem>>
      %100 = tpu.memref_squeeze %99 : memref<1x!tpu.dma_semaphore, #tpu.memory_space<semaphore_mem>> -> memref<!tpu.dma_semaphore, #tpu.memory_space<semaphore_mem>>
      tpu.enqueue_dma source(%96 : memref<128xf32, #tpu.memory_space<any>>) target(%98 : memref<128xf32, #tpu.memory_space<vmem>>) target_semaphore(%100 : memref<!tpu.dma_semaphore, #tpu.memory_space<semaphore_mem>>)
      %c2_i32_44 = arith.constant 2 : i32
      %101 = arith.addi %82, %c2_i32_44 : i32
      %102 = arith.index_cast %101 : i32 to index
      %103 = memref.load %arg1[%102] : memref<16xi32, #tpu.memory_space<smem>>
      %c0_i32_45 = arith.constant 0 : i32
      %104 = tpu.memref_slice %arg3[%103, %c0_i32_45] : memref<96x128xf32, #tpu.memory_space<any>> -> memref<1x128xf32, #tpu.memory_space<any>>
      %105 = tpu.memref_squeeze %104 : memref<1x128xf32, #tpu.memory_space<any>> -> memref<128xf32, #tpu.memory_space<any>>
      %c0_i32_46 = arith.constant 0 : i32
      %106 = tpu.memref_slice %arg9[%81, %c2_i32_44, %c0_i32_46] : memref<2x8x128xf32, #tpu.memory_space<vmem>> -> memref<1x1x128xf32, #tpu.memory_space<vmem>>
      %107 = tpu.memref_squeeze %106 : memref<1x1x128xf32, #tpu.memory_space<vmem>> -> memref<128xf32, #tpu.memory_space<vmem>>
      %108 = tpu.memref_slice %arg10[%81] : memref<2x!tpu.dma_semaphore, #tpu.memory_space<semaphore_mem>> -> memref<1x!tpu.dma_semaphore, #tpu.memory_space<semaphore_mem>>
      %109 = tpu.memref_squeeze %108 : memref<1x!tpu.dma_semaphore, #tpu.memory_space<semaphore_mem>> -> memref<!tpu.dma_semaphore, #tpu.memory_space<semaphore_mem>>
      tpu.enqueue_dma source(%105 : memref<128xf32, #tpu.memory_space<any>>) target(%107 : memref<128xf32, #tpu.memory_space<vmem>>) target_semaphore(%109 : memref<!tpu.dma_semaphore, #tpu.memory_space<semaphore_mem>>)
      %c3_i32 = arith.constant 3 : i32
      %110 = arith.addi %82, %c3_i32 : i32
      %111 = arith.index_cast %110 : i32 to index
      %112 = memref.load %arg1[%111] : memref<16xi32, #tpu.memory_space<smem>>
      %c0_i32_47 = arith.constant 0 : i32
      %113 = tpu.memref_slice %arg3[%112, %c0_i32_47] : memref<96x128xf32, #tpu.memory_space<any>> -> memref<1x128xf32, #tpu.memory_space<any>>
      %114 = tpu.memref_squeeze %113 : memref<1x128xf32, #tpu.memory_space<any>> -> memref<128xf32, #tpu.memory_space<any>>
      %c0_i32_48 = arith.constant 0 : i32
      %115 = tpu.memref_slice %arg9[%81, %c3_i32, %c0_i32_48] : memref<2x8x128xf32, #tpu.memory_space<vmem>> -> memref<1x1x128xf32, #tpu.memory_space<vmem>>
      %116 = tpu.memref_squeeze %115 : memref<1x1x128xf32, #tpu.memory_space<vmem>> -> memref<128xf32, #tpu.memory_space<vmem>>
      %117 = tpu.memref_slice %arg10[%81] : memref<2x!tpu.dma_semaphore, #tpu.memory_space<semaphore_mem>> -> memref<1x!tpu.dma_semaphore, #tpu.memory_space<semaphore_mem>>
      %118 = tpu.memref_squeeze %117 : memref<1x!tpu.dma_semaphore, #tpu.memory_space<semaphore_mem>> -> memref<!tpu.dma_semaphore, #tpu.memory_space<semaphore_mem>>
      tpu.enqueue_dma source(%114 : memref<128xf32, #tpu.memory_space<any>>) target(%116 : memref<128xf32, #tpu.memory_space<vmem>>) target_semaphore(%118 : memref<!tpu.dma_semaphore, #tpu.memory_space<semaphore_mem>>)
      %c4_i32 = arith.constant 4 : i32
      %119 = arith.addi %82, %c4_i32 : i32
      %120 = arith.index_cast %119 : i32 to index
      %121 = memref.load %arg1[%120] : memref<16xi32, #tpu.memory_space<smem>>
      %c0_i32_49 = arith.constant 0 : i32
      %122 = tpu.memref_slice %arg3[%121, %c0_i32_49] : memref<96x128xf32, #tpu.memory_space<any>> -> memref<1x128xf32, #tpu.memory_space<any>>
      %123 = tpu.memref_squeeze %122 : memref<1x128xf32, #tpu.memory_space<any>> -> memref<128xf32, #tpu.memory_space<any>>
      %c0_i32_50 = arith.constant 0 : i32
      %124 = tpu.memref_slice %arg9[%81, %c4_i32, %c0_i32_50] : memref<2x8x128xf32, #tpu.memory_space<vmem>> -> memref<1x1x128xf32, #tpu.memory_space<vmem>>
      %125 = tpu.memref_squeeze %124 : memref<1x1x128xf32, #tpu.memory_space<vmem>> -> memref<128xf32, #tpu.memory_space<vmem>>
      %126 = tpu.memref_slice %arg10[%81] : memref<2x!tpu.dma_semaphore, #tpu.memory_space<semaphore_mem>> -> memref<1x!tpu.dma_semaphore, #tpu.memory_space<semaphore_mem>>
      %127 = tpu.memref_squeeze %126 : memref<1x!tpu.dma_semaphore, #tpu.memory_space<semaphore_mem>> -> memref<!tpu.dma_semaphore, #tpu.memory_space<semaphore_mem>>
      tpu.enqueue_dma source(%123 : memref<128xf32, #tpu.memory_space<any>>) target(%125 : memref<128xf32, #tpu.memory_space<vmem>>) target_semaphore(%127 : memref<!tpu.dma_semaphore, #tpu.memory_space<semaphore_mem>>)
      %c5_i32 = arith.constant 5 : i32
      %128 = arith.addi %82, %c5_i32 : i32
      %129 = arith.index_cast %128 : i32 to index
      %130 = memref.load %arg1[%129] : memref<16xi32, #tpu.memory_space<smem>>
      %c0_i32_51 = arith.constant 0 : i32
      %131 = tpu.memref_slice %arg3[%130, %c0_i32_51] : memref<96x128xf32, #tpu.memory_space<any>> -> memref<1x128xf32, #tpu.memory_space<any>>
      %132 = tpu.memref_squeeze %131 : memref<1x128xf32, #tpu.memory_space<any>> -> memref<128xf32, #tpu.memory_space<any>>
      %c0_i32_52 = arith.constant 0 : i32
      %133 = tpu.memref_slice %arg9[%81, %c5_i32, %c0_i32_52] : memref<2x8x128xf32, #tpu.memory_space<vmem>> -> memref<1x1x128xf32, #tpu.memory_space<vmem>>
      %134 = tpu.memref_squeeze %133 : memref<1x1x128xf32, #tpu.memory_space<vmem>> -> memref<128xf32, #tpu.memory_space<vmem>>
      %135 = tpu.memref_slice %arg10[%81] : memref<2x!tpu.dma_semaphore, #tpu.memory_space<semaphore_mem>> -> memref<1x!tpu.dma_semaphore, #tpu.memory_space<semaphore_mem>>
      %136 = tpu.memref_squeeze %135 : memref<1x!tpu.dma_semaphore, #tpu.memory_space<semaphore_mem>> -> memref<!tpu.dma_semaphore, #tpu.memory_space<semaphore_mem>>
      tpu.enqueue_dma source(%132 : memref<128xf32, #tpu.memory_space<any>>) target(%134 : memref<128xf32, #tpu.memory_space<vmem>>) target_semaphore(%136 : memref<!tpu.dma_semaphore, #tpu.memory_space<semaphore_mem>>)
      %c6_i32 = arith.constant 6 : i32
      %137 = arith.addi %82, %c6_i32 : i32
      %138 = arith.index_cast %137 : i32 to index
      %139 = memref.load %arg1[%138] : memref<16xi32, #tpu.memory_space<smem>>
      %c0_i32_53 = arith.constant 0 : i32
      %140 = tpu.memref_slice %arg3[%139, %c0_i32_53] : memref<96x128xf32, #tpu.memory_space<any>> -> memref<1x128xf32, #tpu.memory_space<any>>
      %141 = tpu.memref_squeeze %140 : memref<1x128xf32, #tpu.memory_space<any>> -> memref<128xf32, #tpu.memory_space<any>>
      %c0_i32_54 = arith.constant 0 : i32
      %142 = tpu.memref_slice %arg9[%81, %c6_i32, %c0_i32_54] : memref<2x8x128xf32, #tpu.memory_space<vmem>> -> memref<1x1x128xf32, #tpu.memory_space<vmem>>
      %143 = tpu.memref_squeeze %142 : memref<1x1x128xf32, #tpu.memory_space<vmem>> -> memref<128xf32, #tpu.memory_space<vmem>>
      %144 = tpu.memref_slice %arg10[%81] : memref<2x!tpu.dma_semaphore, #tpu.memory_space<semaphore_mem>> -> memref<1x!tpu.dma_semaphore, #tpu.memory_space<semaphore_mem>>
      %145 = tpu.memref_squeeze %144 : memref<1x!tpu.dma_semaphore, #tpu.memory_space<semaphore_mem>> -> memref<!tpu.dma_semaphore, #tpu.memory_space<semaphore_mem>>
      tpu.enqueue_dma source(%141 : memref<128xf32, #tpu.memory_space<any>>) target(%143 : memref<128xf32, #tpu.memory_space<vmem>>) target_semaphore(%145 : memref<!tpu.dma_semaphore, #tpu.memory_space<semaphore_mem>>)
      %c7_i32 = arith.constant 7 : i32
      %146 = arith.addi %82, %c7_i32 : i32
      %147 = arith.index_cast %146 : i32 to index
      %148 = memref.load %arg1[%147] : memref<16xi32, #tpu.memory_space<smem>>
      %c0_i32_55 = arith.constant 0 : i32
      %149 = tpu.memref_slice %arg3[%148, %c0_i32_55] : memref<96x128xf32, #tpu.memory_space<any>> -> memref<1x128xf32, #tpu.memory_space<any>>
      %150 = tpu.memref_squeeze %149 : memref<1x128xf32, #tpu.memory_space<any>> -> memref<128xf32, #tpu.memory_space<any>>
      %c0_i32_56 = arith.constant 0 : i32
      %151 = tpu.memref_slice %arg9[%81, %c7_i32, %c0_i32_56] : memref<2x8x128xf32, #tpu.memory_space<vmem>> -> memref<1x1x128xf32, #tpu.memory_space<vmem>>
      %152 = tpu.memref_squeeze %151 : memref<1x1x128xf32, #tpu.memory_space<vmem>> -> memref<128xf32, #tpu.memory_space<vmem>>
      %153 = tpu.memref_slice %arg10[%81] : memref<2x!tpu.dma_semaphore, #tpu.memory_space<semaphore_mem>> -> memref<1x!tpu.dma_semaphore, #tpu.memory_space<semaphore_mem>>
      %154 = tpu.memref_squeeze %153 : memref<1x!tpu.dma_semaphore, #tpu.memory_space<semaphore_mem>> -> memref<!tpu.dma_semaphore, #tpu.memory_space<semaphore_mem>>
      tpu.enqueue_dma source(%150 : memref<128xf32, #tpu.memory_space<any>>) target(%152 : memref<128xf32, #tpu.memory_space<vmem>>) target_semaphore(%154 : memref<!tpu.dma_semaphore, #tpu.memory_space<semaphore_mem>>)
      %c8_i32_57 = arith.constant 8 : i32
    } else {
    }
    %c1_i32_8 = arith.constant 1 : i32
    %c0_i32_9 = arith.constant 0 : i32
    %17 = arith.cmpi eq, %c1_i32_8, %c0_i32_9 : i32
    %c1_i32_10 = arith.constant 1 : i32
    %18 = arith.select %17, %c1_i32_10, %c1_i32_8 : i32
    %19 = arith.remsi %arg0, %18 : i32
    %c0_i32_11 = arith.constant 0 : i32
    %20 = arith.cmpi ne, %19, %c0_i32_11 : i32
    %c0_i32_12 = arith.constant 0 : i32
    %21 = arith.cmpi slt, %19, %c0_i32_12 : i32
    %c0_i32_13 = arith.constant 0 : i32
    %22 = arith.cmpi slt, %18, %c0_i32_13 : i32
    %23 = arith.xori %21, %22 : i1
    %24 = arith.andi %23, %20 : i1
    %25 = arith.addi %19, %18 : i32
    %26 = arith.select %24, %25, %19 : i32
    %c8_i32 = arith.constant 8 : i32
    %27 = arith.muli %26, %c8_i32 : i32
    %28 = tpu.assume_multiple %27, 8 : i32
    %29 = arith.index_cast %28 : i32 to index
    %c0 = arith.constant 0 : index
    %30 = vector.load %arg4[%29, %c0] : memref<8x128xf32, #tpu.memory_space<vmem>>, vector<8x128xf32>
    %c0_14 = arith.constant 0 : index
    %c0_15 = arith.constant 0 : index
    %31 = vector.load %arg5[%c0_14, %c0_15] : memref<2x128xf32, #tpu.memory_space<vmem>>, vector<2x128xf32>
    %c0_16 = arith.constant 0 : index
    %c0_17 = arith.constant 0 : index
    %32 = vector.load %arg2[%c0_16, %c0_17] : memref<8x1xi32, #tpu.memory_space<vmem>>, vector<8x1xi32>
    %33 = arith.sitofp %32 : vector<8x1xi32> to vector<8x1xf32>
    %34 = vector.extract_strided_slice %31 {offsets = [0, 0], sizes = [1, 128], strides = [1, 1]} : vector<2x128xf32> to vector<1x128xf32>
    %35 = vector.broadcast %34 : vector<1x128xf32> to vector<8x128xf32>
    %36 = arith.addf %30, %35 : vector<8x128xf32>
    %37 = vector.extract_strided_slice %31 {offsets = [1, 0], sizes = [1, 128], strides = [1, 1]} : vector<2x128xf32> to vector<1x128xf32>
    %38 = vector.extract_strided_slice %31 {offsets = [0, 0], sizes = [1, 128], strides = [1, 1]} : vector<2x128xf32> to vector<1x128xf32>
    %39 = arith.subf %37, %38 : vector<1x128xf32>
    %40 = vector.broadcast %33 : vector<8x1xf32> to vector<8x128xf32>
    %41 = vector.broadcast %39 : vector<1x128xf32> to vector<8x128xf32>
    %42 = arith.mulf %40, %41 : vector<8x128xf32>
    %43 = arith.addf %36, %42 : vector<8x128xf32>
    %c0_i32_18 = arith.constant 0 : i32
    %c0_i32_19 = arith.constant 0 : i32
    %44 = tpu.memref_slice %arg3[%c0_i32_18, %c0_i32_19] : memref<96x128xf32, #tpu.memory_space<any>> -> memref<8x128xf32, #tpu.memory_space<any>>
    %c0_i32_20 = arith.constant 0 : i32
    %c0_i32_21 = arith.constant 0 : i32
    %45 = tpu.memref_slice %arg9[%9, %c0_i32_20, %c0_i32_21] : memref<2x8x128xf32, #tpu.memory_space<vmem>> -> memref<1x8x128xf32, #tpu.memory_space<vmem>>
    %46 = tpu.memref_squeeze %45 : memref<1x8x128xf32, #tpu.memory_space<vmem>> -> memref<8x128xf32, #tpu.memory_space<vmem>>
    %47 = tpu.memref_slice %arg10[%9] : memref<2x!tpu.dma_semaphore, #tpu.memory_space<semaphore_mem>> -> memref<1x!tpu.dma_semaphore, #tpu.memory_space<semaphore_mem>>
    %48 = tpu.memref_squeeze %47 : memref<1x!tpu.dma_semaphore, #tpu.memory_space<semaphore_mem>> -> memref<!tpu.dma_semaphore, #tpu.memory_space<semaphore_mem>>
    tpu.wait_dma2 semaphore(%48 : memref<!tpu.dma_semaphore, #tpu.memory_space<semaphore_mem>>) src(%44 : memref<8x128xf32, #tpu.memory_space<any>>) dst(%46 : memref<8x128xf32, #tpu.memory_space<vmem>>)
    %49 = arith.index_cast %9 : i32 to index
    %c0_22 = arith.constant 0 : index
    %c0_23 = arith.constant 0 : index
    %50 = vector.load %arg9[%49, %c0_22, %c0_23] : memref<2x8x128xf32, #tpu.memory_space<vmem>>, vector<1x8x128xf32>
    %51 = vector.shape_cast %50 : vector<1x8x128xf32> to vector<8x128xf32>
    %52 = arith.addf %51, %43 : vector<8x128xf32>
    %cst = arith.constant dense<0.000000e+00> : vector<8xf32>
    %53 = vector.multi_reduction <add>, %52, %cst [1] : vector<8x128xf32> to vector<8xf32>
    %54 = vector.shape_cast %53 : vector<8xf32> to vector<8x1xf32>
    %55 = arith.mulf %52, %52 : vector<8x128xf32>
    %cst_24 = arith.constant dense<0.000000e+00> : vector<8xf32>
    %56 = vector.multi_reduction <add>, %55, %cst_24 [1] : vector<8x128xf32> to vector<8xf32>
    %57 = vector.shape_cast %56 : vector<8xf32> to vector<8x1xf32>
    %cst_25 = arith.constant 7.812500e-03 : f32
    %58 = vector.broadcast %cst_25 : f32 to vector<8x1xf32>
    %59 = arith.mulf %54, %58 : vector<8x1xf32>
    %cst_26 = arith.constant 7.812500e-03 : f32
    %60 = vector.broadcast %cst_26 : f32 to vector<8x1xf32>
    %61 = arith.mulf %57, %60 : vector<8x1xf32>
    %62 = arith.mulf %59, %59 : vector<8x1xf32>
    %63 = arith.subf %61, %62 : vector<8x1xf32>
    %cst_27 = arith.constant 0.000000e+00 : f32
    %64 = vector.broadcast %cst_27 : f32 to vector<8x1xf32>
    %65 = arith.maximumf %63, %64 : vector<8x1xf32>
    %cst_28 = arith.constant 9.99999996E-13 : f32
    %66 = vector.broadcast %cst_28 : f32 to vector<8x1xf32>
    %67 = arith.addf %65, %66 : vector<8x1xf32>
    %68 = math.rsqrt %67 : vector<8x1xf32>
    %69 = vector.broadcast %59 : vector<8x1xf32> to vector<8x128xf32>
    %70 = arith.subf %52, %69 : vector<8x128xf32>
    %71 = vector.broadcast %68 : vector<8x1xf32> to vector<8x128xf32>
    %72 = arith.mulf %70, %71 : vector<8x128xf32>
    %c0_29 = arith.constant 0 : index
    %c0_30 = arith.constant 0 : index
    %73 = vector.load %arg6[%c0_29, %c0_30] : memref<1x128xf32, #tpu.memory_space<vmem>>, vector<1x128xf32>
    %74 = vector.broadcast %73 : vector<1x128xf32> to vector<8x128xf32>
    %75 = arith.mulf %72, %74 : vector<8x128xf32>
    %c0_31 = arith.constant 0 : index
    %c0_32 = arith.constant 0 : index
    %76 = vector.load %arg7[%c0_31, %c0_32] : memref<1x128xf32, #tpu.memory_space<vmem>>, vector<1x128xf32>
    %77 = vector.broadcast %76 : vector<1x128xf32> to vector<8x128xf32>
    %78 = arith.addf %75, %77 : vector<8x128xf32>
    %c0_33 = arith.constant 0 : index
    %c0_34 = arith.constant 0 : index
    %79 = vector.load %arg8[%c0_33, %c0_34] : memref<8x128xf32, #tpu.memory_space<vmem>>, vector<8x128xf32>
    tpu.vector_store %arg8[%c0_33, %c0_34], %78 {strides = array<i32>} : memref<8x128xf32, #tpu.memory_space<vmem>>, vector<8x128xf32>,
    return
  }
  func.func @transform_0(%arg0: i32, %arg1: memref<16xi32, #tpu.memory_space<smem>>) -> (i32, i32) {
    %c0_i32 = arith.constant 0 : i32
    %c0_i32_0 = arith.constant 0 : i32
    return %arg0, %c0_i32 : i32, i32
  }
  func.func @transform_2(%arg0: i32, %arg1: memref<16xi32, #tpu.memory_space<smem>>) -> (i32, i32) {
    %c0_i32 = arith.constant 0 : i32
    %c0_i32_0 = arith.constant 0 : i32
    %c0_i32_1 = arith.constant 0 : i32
    return %c0_i32, %c0_i32_0 : i32, i32
  }
  func.func @transform_3(%arg0: i32, %arg1: memref<16xi32, #tpu.memory_space<smem>>) -> (i32, i32) {
    %c0_i32 = arith.constant 0 : i32
    %c0_i32_0 = arith.constant 0 : i32
    %c0_i32_1 = arith.constant 0 : i32
    return %c0_i32, %c0_i32_0 : i32, i32
  }
  func.func @transform_4(%arg0: i32, %arg1: memref<16xi32, #tpu.memory_space<smem>>) -> (i32, i32) {
    %c0_i32 = arith.constant 0 : i32
    %c0_i32_0 = arith.constant 0 : i32
    %c0_i32_1 = arith.constant 0 : i32
    return %c0_i32, %c0_i32_0 : i32, i32
  }
  func.func @transform_5(%arg0: i32, %arg1: memref<16xi32, #tpu.memory_space<smem>>) -> (i32, i32) {
    %c0_i32 = arith.constant 0 : i32
    %c0_i32_0 = arith.constant 0 : i32
    %c0_i32_1 = arith.constant 0 : i32
    return %c0_i32, %c0_i32_0 : i32, i32
  }
  func.func @transform_6(%arg0: i32, %arg1: memref<16xi32, #tpu.memory_space<smem>>) -> (i32, i32) {
    %c0_i32 = arith.constant 0 : i32
    %c0_i32_0 = arith.constant 0 : i32
    return %arg0, %c0_i32 : i32, i32
  }
}

</mosaic_0001>

<bundles_post_ra>
// kernel: tpu_custom_call.1
= control target key start
LH: loop header
LB: loop body
LE: loop exit
PB: predicated region body
PF: predicated region fallthrough
CT: control target
= control target key end

     0   :  { %s2044_s0 = inlined_call_operand.vmem [shape: s32[16], index: 0, kind: input, shape index: {}]   ;;  %s2045_s1 = inlined_call_operand.vmem [shape: s32[16,1], index: 1, kind: input, shape index: {}]   ;;  %s2046_s2 = inlined_call_operand.hbm [shape: f32[96,128], index: 2, kind: input, shape index: {}]   ;;  %s2047_s3 = inlined_call_operand.vmem [shape: f32[8,128], index: 3, kind: input, shape index: {}]   ;;  %s2048_s4 = inlined_call_operand.vmem [shape: f32[2,128], index: 4, kind: input, shape index: {}]   ;;  %s2049_s5 = inlined_call_operand.vmem [shape: f32[1,128], index: 5, kind: input, shape index: {}]   ;;  %s2050_s6 = inlined_call_operand.vmem [shape: f32[1,128], index: 6, kind: input, shape index: {}]   ;;  %s2051_s7 = inlined_call_operand.hbm [shape: f32[16,128], index: 7, kind: output, shape index: {}]  }
   0x1   :  { %2065 = sst [smem:[#allocation69_spill]] %s2045_s1  ;;  %s12_s26 = sshll.u32 %s2044_s0, 4  ;;  %s13_s26 = int_to_ptr.vmem [resolvable:$true] %s12_s26 }
   0x2   :  { %2066 = sst [smem:[#allocation70_spill]] %s2049_s5  ;;  %s908_s27 = scalar_lea.vmem %s13_s26, 16 }
   0x3   :  { %2067 = sst [smem:[#allocation71_spill]] %s2050_s6  ;;  %p909_p0 = scmp.ne.s32.totalorder %s13_s26, %s908_s27 }
   0x4   :  { %2068 = sst [smem:[#allocation72_spill]] %s2051_s7  ;;  %p913_p1 = scmp.lt.s32.totalorder %s13_s26, %s13_s26 }
   0x5   :  { %p914_p2 = scmp.lt.s32.totalorder %s908_s27, %s908_s27 }
   0x7   :  { %p915_p3 = por %p914_p2, %p913_p1 }
   0x9   :  { %p916_p4 = pnand %p915_p3, %p909_p0 }
   0xb   :  { %919 = shalt.err (!%p916_p4)  }
   0xc   :  { %s1402_s28 = smov [#allocation5]  }
   0xd   :  { %15 = dma.vmem_to_smem %s13_s26, 16, %s1402_s28, [#allocation4] }
   0xe   :  { %1378 = dma.done.wait [#allocation4], 16 }
   0xf   :  { %1379 = vsyncadd [#allocation4], 4294967280 }
  0x10   :  { %17 = sfence }
  0x11   :  { %18 = vsyncpa [#allocation7], 0 }
  0x12   :  { %20 = vsyncpa [#allocation7 + $0x1], 0  ;;  %s1449_s29 = smov 0   ;;  %s1451_s30 = smov 0  }
  0x13   :  { %s1453_s0 = smov 0   ;;  %s1455_s8 = smov 0  }
  0x14 LB: > { %2069 = sst [smem:[#allocation61_spill]] %s1388_s29  ;;  %s1470_s9 = sadd.s32 4294967295, %s1400_s8   ;;  %s1400_s8 = sphi %s1455_s8, %s2093_s8   ;;  %s1396_s0 = sphi %s1453_s0, %s2096_s0   ;;  %s1392_s30 = sphi %s1451_s30, %s2095_s30   ;;  %s1388_s29 = sphi %s1449_s29, %s2094_s29  }
  0x15   : > { %2070 = sst [smem:[#allocation62_spill]] %s1392_s30  ;;  %s756_s10 = sadd.s32 4294967294, %s1400_s8  }
  0x16   : > { %2071 = sst [smem:[#allocation63_spill]] %s1396_s0  ;;  %s1474_s11 = sadd.s32 1, %s1400_s8  }
  0x17   : > { %2072 = sst [smem:[#allocation64_spill]] %s1400_s8  ;;  %s143_s12 = sadd.s32 1, %s1396_s0 }
  0x18   : > { %2073 = sst [smem:[#allocation65_spill]] %s1474_s11  ;;  %s140_s13 = ssub.s32 %s1400_s8, %s1474_s11 }
  0x19   : > { %p153_p5 = scmp.ne.s32.totalorder %s1396_s0, %s1392_s30  ;;  %p141_p6 = scmp.eq.s32.totalorder %s140_s13, 0 }
  0x1a   : > { %p154_p7 = scmp.eq.s32.totalorder %s1470_s9, 1  ;;  %p159_p8 = scmp.ne.s32.totalorder %s1392_s30, %s1388_s29 }
  0x1b   : > { %p160_p9 = scmp.eq.s32.totalorder %s756_s10, 1  ;;  %p759_p12 = scmp.ge.s32.totalorder %s1400_s8, 1 }
  0x1c   : > { %s1485_s14 = scalar_select %p141_p6, %s1396_s0, %s143_s12  }
  0x1d   : > { %p1487_p10 = por %p154_p7, %p153_p5  ;;  %p1491_p11 = por %p160_p9, %p159_p8 }
  0x1e   : > { %2074 = sst [smem:[#allocation66_spill]] %s1485_s14  ;;  %p197_p13 = scmp.lt.s32.totalorder %s1400_s8, 3 }
  0x1f   : > { %s2075_s15 = scalar_select %p1487_p10, 1, 0 }
  0x20   : > { %s2077_s16 = scalar_select %p1491_p11, 1, 0 }
  0x21   : > { %2076 = sst [smem:[#allocation67_spill]] %s2075_s15  ;;  %p198_p0 = pnand %p759_p12, %p197_p13 }
  0x22   : > { %2078 = sst [smem:[#allocation68_spill]] %s2077_s16  ;;  %p224_p1 = scmp.lt.s32.totalorder (!%p198_p0), %s1470_s9, 1 }
  0x23   : > { %201 = sbr.rel (%p198_p0) target bundleno = 653 (0x28d), region = 40  ;;  %s2052_s17 = sand.u32 (!%p198_p0), 1, %s1392_s30  }
  0x24   : > { %s1501_s18 = sshll.u32 (!%p198_p0), %s2052_s17, 3  ;;  %p228_p2 = scmp.lt.s32.totalorder (!%p198_p0), %s1470_s9, 0 }
  0x25   : > { %s229_s20 = ssub.s32 (!%p198_p0), 0, %s1470_s9  ;;  %s2079_s1 = sld [smem:[#allocation69_spill]] (!%p198_p0) }
  0x26   : > { %s762_s22 = smin.u32 (!%p198_p0), %s1470_s9, %s229_s20  ;;  %p868_p3 = scmp.eq.s32.totalorder (!%p198_p0), %s1470_s9, 0 }
  0x27   : > { %s231_s26 = sand.u32 (!%p198_p0), 1, %s762_s22   ;;  %s1512_s28 = sshll.u32 (!%p198_p0), %s1470_s9, 3 }
  0x28   : > { %v1403_v0 = vmov 0   ;;  %s225_s19 = scalar_select %p224_p1, %s1470_s9, 1 }
  0x29   : > { %905 = vset.pattern.permute.xlu0 %v1403_v0  ;;  %s232_s27 = ssub.s32 0, %s231_s26  ;;  %s262_s23 = sadd.s32 1, %s1512_s28 }
  0x2a   : > { %s761_s21 = sshll.u32 %s225_s19, 3  ;;  %s2098_s27 = smov (!%p228_p2, %s232_s27), %s231_s26 }
  0x2b   : > { %s227_s25 = scalar_lea.vmem %s2079_s1, %s761_s21  ;;  %p764_p4 = scmp.lt.s32.totalorder %s2098_s27, 0 }
  0x2c   : > { %v526_v1 = vld [vmem:[%s227_s25] sm:$0xff]  ;;  %s238_s10 = sadd.s32 2, %s2098_s27  ;;  %s2102_s23 = smov (!%p868_p3, %s262_s23), 0 }
  0x2d   : > { %v527_v2 = vcvt.s32.f32 %v526_v1  ;;  %s813_s12 = scalar_select %p868_p3, [#allocation5], [#allocation42] }
  0x2e   : > { %s2100_s10 = smov (!%p764_p4, %s238_s10), %s2098_s27  ;;  %s279_s27 = sadd.s32 2, %s1512_s28 }
  0x2f   : > { %539 = vperm.xlu0 %905, %v527_v2   ;;  %s814_s13 = scalar_select %p868_p3, %s1512_s28, 0 }
  0x30   : > { %s768_s19 = sshll.u32 %s2100_s10, 3  ;;  %s1542_s14 = scalar_lea.sflag [#allocation3], %s2100_s10 }
  0x31   : > { %s245_s20 = sld [smem:[%s813_s12 + %s814_s13]]  ;;  %s1522_s21 = scalar_lea.vmem [#allocation2], %s768_s19 }
  0x32   : > { %s258_s22 = sshll.u32 %s1522_s21, 4  ;;  %s653_s24 = scalar_lea.vmem %s1522_s21, 1 [#allocation2]  ;;  %s1526_s22 = int_to_ptr.vmem [resolvable:$true] %s258_s22 }
  0x33   : > { %s816_s25 = scalar_select %p868_p3, [#allocation5], [#allocation43] }
  0x34   : > { %s275_s26 = sshll.u32 %s653_s24, 4  ;;  %s1549_s24 = scalar_lea.hbm %s2046_s2, 1536  ;;  %s1539_s26 = int_to_ptr.vmem [resolvable:$true] %s275_s26 }
  0x35   : > { %s1534_s1 = sld [smem:[%s816_s25 + %s2102_s23]] }
  0x37   : > { %s767_s17 = sshll.u32 %s245_s20, 4 }
  0x38   : > { %s247_s19 = scalar_lea.hbm %s2046_s2, %s767_s17 }
  0x39   : > { %s920_s0 = scalar_lea.hbm %s247_s19, 16  ;;  %p925_p8 = scmp.lt.s32.totalorder %s247_s19, %s2046_s2 }
  0x3a   : > { %p921_p5 = scmp.ne.s32.totalorder %s247_s19, %s920_s0  ;;  %p926_p9 = scmp.lt.s32.totalorder %s1549_s24, %s920_s0 }
  0x3c   : > { %p922_p6 = pnand %p921_p5, %p868_p3  ;;  %p927_p12 = por %p926_p9, %p925_p8 }
  0x3e   : > { %p923_p7 = pneg %p922_p6 }
  0x40   : > { %p928_p13 = pnand %p927_p12, %p923_p7 }
  0x42   : > { %931 = shalt.err (!%p928_p13)  }
  0x43   : > { %s932_s17 = scalar_lea.vmem %s1526_s22, 16  ;;  %s1404_s11 = smov [#allocation2]  }
  0x44   : > { %p933_p0 = scmp.ne.s32.totalorder %s1526_s22, %s932_s17  ;;  %s936_s16 = sshll.u32 %s1404_s11, 4  ;;  %s1559_s16 = int_to_ptr.vmem [resolvable:$false] %s936_s16 }
  0x45   : > { %s1562_s25 = scalar_lea.vmem %s1559_s16, 256  ;;  %p939_p4 = scmp.lt.s32.totalorder %s1526_s22, %s1559_s16 }
  0x46   : > { %p934_p1 = pnand %p933_p0, %p868_p3  ;;  %p940_p5 = scmp.lt.s32.totalorder %s1562_s25, %s932_s17 }
  0x48   : > { %p935_p2 = pneg %p934_p1  ;;  %p941_p6 = por %p940_p5, %p939_p4 }
  0x4a   : > { %p942_p7 = pnand %p941_p6, %p935_p2 }
  0x4c   : > { %945 = shalt.err (!%p942_p7)  }
  0x4d   : > { %815 = dma.hbm_to_vmem [thread:$0]  (%p868_p3), %s247_s19, 16, %s1526_s22, %s1542_s14 }
  0x4e   : > { %s819_s0 = scalar_select %p868_p3, [#allocation5], [#allocation44] }
  0x4f   : > { %s2104_s27 = smov (!%p868_p3, %s279_s27), 0  ;;  %s658_s12 = scalar_lea.vmem %s1522_s21, 2 [#allocation2] }
  0x50   : > { %s296_s13 = sadd.s32 3, %s1512_s28  ;;  %s769_s20 = sshll.u32 %s1534_s1, 4 }
  0x51   : > { %s1580_s23 = sld [smem:[%s819_s0 + %s2104_s27]]  ;;  %s265_s29 = scalar_lea.hbm %s2046_s2, %s769_s20 }
  0x52   : > { %s292_s8 = sshll.u32 %s658_s12, 4  ;;  %s946_s7 = scalar_lea.hbm %s265_s29, 16  ;;  %s293_s8 = int_to_ptr.vmem [resolvable:$true] %s292_s8 }
  0x53   : > { %p947_p8 = scmp.ne.s32.totalorder %s265_s29, %s946_s7  ;;  %p951_p13 = scmp.lt.s32.totalorder %s265_s29, %s2046_s2 }
  0x54   : > { %p952_p0 = scmp.lt.s32.totalorder %s1549_s24, %s946_s7 }
  0x55   : > { %p948_p9 = pnand %p947_p8, %p868_p3 }
  0x56   : > { %p953_p1 = por %p952_p0, %p951_p13 }
  0x57   : > { %p949_p12 = pneg %p948_p9 }
  0x59   : > { %p954_p2 = pnand %p953_p1, %p949_p12 }
  0x5b   : > { %957 = shalt.err (!%p954_p2)  }
  0x5c   : > { %s958_s1 = scalar_lea.vmem %s1539_s26, 16  ;;  %p965_p7 = scmp.lt.s32.totalorder %s1539_s26, %s1559_s16 }
  0x5d   : > { %p959_p4 = scmp.ne.s32.totalorder %s1539_s26, %s958_s1  ;;  %p966_p8 = scmp.lt.s32.totalorder %s1562_s25, %s958_s1 }
  0x5f   : > { %p960_p5 = pnand %p959_p4, %p868_p3  ;;  %p967_p9 = por %p966_p8, %p965_p7 }
  0x61   : > { %p961_p6 = pneg %p960_p5 }
  0x63   : > { %p968_p11 = pnand %p967_p9, %p961_p6 }
  0x65   : > { %971 = shalt.err (!%p968_p11)  }
  0x66   : > { %818 = dma.hbm_to_vmem [thread:$0]  (%p868_p3), %s265_s29, 16, %s1539_s26, %s1542_s14 }
  0x67   : > { %s663_s7 = scalar_lea.vmem %s1522_s21, 3 [#allocation2]  ;;  %s2106_s13 = smov (!%p868_p3, %s296_s13), 0 }
  0x68   : > { %s822_s27 = scalar_select %p868_p3, [#allocation5], [#allocation45] }
  0x69   : > { %s771_s0 = sshll.u32 %s1580_s23, 4  ;;  %s309_s12 = sshll.u32 %s663_s7, 4  ;;  %s1626_s12 = int_to_ptr.vmem [resolvable:$true] %s309_s12 }
  0x6a   : > { %s282_s11 = scalar_lea.hbm %s2046_s2, %s771_s0  ;;  %s1611_s22 = sld [smem:[%s822_s27 + %s2106_s13]] }
  0x6b   : > { %s972_s19 = scalar_lea.hbm %s282_s11, 16  ;;  %p977_p0 = scmp.lt.s32.totalorder %s282_s11, %s2046_s2 }
  0x6c   : > { %p973_p11 = scmp.ne.s32.totalorder %s282_s11, %s972_s19  ;;  %p978_p1 = scmp.lt.s32.totalorder %s1549_s24, %s972_s19 }
  0x6e   : > { %p974_p12 = pnand %p973_p11, %p868_p3  ;;  %p979_p2 = por %p978_p1, %p977_p0 }
  0x70   : > { %p975_p13 = pneg %p974_p12 }
  0x72   : > { %p980_p4 = pnand %p979_p2, %p975_p13 }
  0x74   : > { %983 = shalt.err (!%p980_p4)  }
  0x75   : > { %s984_s23 = scalar_lea.vmem %s293_s8, 16  ;;  %p991_p8 = scmp.lt.s32.totalorder %s293_s8, %s1559_s16 }
  0x76   : > { %p985_p5 = scmp.ne.s32.totalorder %s293_s8, %s984_s23  ;;  %p992_p9 = scmp.lt.s32.totalorder %s1562_s25, %s984_s23 }
  0x78   : > { %p986_p6 = pnand %p985_p5, %p868_p3  ;;  %p993_p11 = por %p992_p9, %p991_p8 }
  0x7a   : > { %p987_p7 = pneg %p986_p6 }
  0x7c   : > { %p994_p12 = pnand %p993_p11, %p987_p7 }
  0x7e   : > { %997 = shalt.err (!%p994_p12)  }
  0x7f   : > { %821 = dma.hbm_to_vmem [thread:$0]  (%p868_p3), %s282_s11, 16, %s293_s8, %s1542_s14 }
  0x80   : > { %s313_s13 = sadd.s32 4, %s1512_s28  ;;  %s668_s7 = scalar_lea.vmem %s1522_s21, 4 [#allocation2] }
  0x81   : > { %s825_s1 = scalar_select %p868_p3, [#allocation5], [#allocation46] }
  0x82   : > { %s2108_s13 = smov (!%p868_p3, %s313_s13), 0  ;;  %s330_s27 = sadd.s32 5, %s1512_s28 }
  0x83   : > { %s773_s0 = sshll.u32 %s1611_s22, 4  ;;  %s1636_s20 = sld [smem:[%s825_s1 + %s2108_s13]] }
  0x84   : > { %s299_s29 = scalar_lea.hbm %s2046_s2, %s773_s0  ;;  %s326_s26 = sshll.u32 %s668_s7, 4  ;;  %s327_s26 = int_to_ptr.vmem [resolvable:$true] %s326_s26 }
  0x85   : > { %s998_s23 = scalar_lea.hbm %s299_s29, 16  ;;  %p1003_p2 = scmp.lt.s32.totalorder %s299_s29, %s2046_s2 }
  0x86   : > { %p999_p13 = scmp.ne.s32.totalorder %s299_s29, %s998_s23  ;;  %p1004_p4 = scmp.lt.s32.totalorder %s1549_s24, %s998_s23 }
  0x88   : > { %p1000_p0 = pnand %p999_p13, %p868_p3  ;;  %p1005_p5 = por %p1004_p4, %p1003_p2 }
  0x8a   : > { %p1001_p1 = pneg %p1000_p0 }
  0x8c   : > { %p1006_p6 = pnand %p1005_p5, %p1001_p1 }
  0x8e   : > { %1009 = shalt.err (!%p1006_p6)  }
  0x8f   : > { %s1010_s22 = scalar_lea.vmem %s1626_s12, 16  ;;  %p1017_p11 = scmp.lt.s32.totalorder %s1626_s12, %s1559_s16 }
  0x90   : > { %p1011_p7 = scmp.ne.s32.totalorder %s1626_s12, %s1010_s22  ;;  %p1018_p12 = scmp.lt.s32.totalorder %s1562_s25, %s1010_s22 }
  0x92   : > { %p1012_p8 = pnand %p1011_p7, %p868_p3  ;;  %p1019_p13 = por %p1018_p12, %p1017_p11 }
  0x94   : > { %p1013_p9 = pneg %p1012_p8 }
  0x96   : > { %p1020_p0 = pnand %p1019_p13, %p1013_p9 }
  0x98   : > { %1023 = shalt.err (!%p1020_p0)  }
  0x99   : > { %824 = dma.hbm_to_vmem [thread:$0]  (%p868_p3), %s299_s29, 16, %s1626_s12, %s1542_s14 }
  0x9a   : > { %s673_s13 = scalar_lea.vmem %s1522_s21, 5 [#allocation2]  ;;  %s2110_s27 = smov (!%p868_p3, %s330_s27), 0 }
  0x9b   : > { %s828_s1 = scalar_select %p868_p3, [#allocation5], [#allocation47] }
  0x9c   : > { %s775_s7 = sshll.u32 %s1636_s20, 4  ;;  %s343_s0 = sshll.u32 %s673_s13, 4  ;;  %s1682_s0 = int_to_ptr.vmem [resolvable:$true] %s343_s0 }
  0x9d   : > { %s316_s23 = scalar_lea.hbm %s2046_s2, %s775_s7  ;;  %s1667_s8 = sld [smem:[%s828_s1 + %s2110_s27]] }
  0x9e   : > { %s1024_s11 = scalar_lea.hbm %s316_s23, 16  ;;  %p1029_p5 = scmp.lt.s32.totalorder %s316_s23, %s2046_s2 }
  0x9f   : > { %p1025_p1 = scmp.ne.s32.totalorder %s316_s23, %s1024_s11  ;;  %p1030_p6 = scmp.lt.s32.totalorder %s1549_s24, %s1024_s11 }
  0xa1   : > { %p1026_p2 = pnand %p1025_p1, %p868_p3  ;;  %p1031_p7 = por %p1030_p6, %p1029_p5 }
  0xa3   : > { %p1027_p4 = pneg %p1026_p2 }
  0xa5   : > { %p1032_p8 = pnand %p1031_p7, %p1027_p4 }
  0xa7   : > { %1035 = shalt.err (!%p1032_p8)  }
  0xa8   : > { %s1036_s20 = scalar_lea.vmem %s327_s26, 16  ;;  %p1043_p13 = scmp.lt.s32.totalorder %s327_s26, %s1559_s16 }
  0xa9   : > { %p1037_p9 = scmp.ne.s32.totalorder %s327_s26, %s1036_s20  ;;  %p1044_p0 = scmp.lt.s32.totalorder %s1562_s25, %s1036_s20 }
  0xab   : > { %p1038_p11 = pnand %p1037_p9, %p868_p3  ;;  %p1045_p1 = por %p1044_p0, %p1043_p13 }
  0xad   : > { %p1039_p12 = pneg %p1038_p11 }
  0xaf   : > { %p1046_p2 = pnand %p1045_p1, %p1039_p12 }
  0xb1   : > { %1049 = shalt.err (!%p1046_p2)  }
  0xb2   : > { %827 = dma.hbm_to_vmem [thread:$0]  (%p868_p3), %s316_s23, 16, %s327_s26, %s1542_s14 }
  0xb3   : > { %s347_s27 = sadd.s32 6, %s1512_s28  ;;  %s678_s13 = scalar_lea.vmem %s1522_s21, 6 [#allocation2] }
  0xb4   : > { %s831_s22 = scalar_select %p868_p3, [#allocation5], [#allocation48] }
  0xb5   : > { %s2112_s27 = smov (!%p868_p3, %s347_s27), 0  ;;  %s364_s1 = sadd.s32 7, %s1512_s28 }
  0xb6   : > { %s777_s7 = sshll.u32 %s1667_s8, 4  ;;  %s1692_s17 = sld [smem:[%s831_s22 + %s2112_s27]] }
  0xb7   : > { %s333_s12 = scalar_lea.hbm %s2046_s2, %s777_s7  ;;  %s360_s29 = sshll.u32 %s678_s13, 4  ;;  %s361_s29 = int_to_ptr.vmem [resolvable:$true] %s360_s29 }
  0xb8   : > { %s1050_s20 = scalar_lea.hbm %s333_s12, 16  ;;  %p1055_p7 = scmp.lt.s32.totalorder %s333_s12, %s2046_s2 }
  0xb9   : > { %p1051_p4 = scmp.ne.s32.totalorder %s333_s12, %s1050_s20  ;;  %p1056_p8 = scmp.lt.s32.totalorder %s1549_s24, %s1050_s20 }
  0xbb   : > { %p1052_p5 = pnand %p1051_p4, %p868_p3  ;;  %p1057_p9 = por %p1056_p8, %p1055_p7 }
  0xbd   : > { %p1053_p6 = pneg %p1052_p5 }
  0xbf   : > { %p1058_p11 = pnand %p1057_p9, %p1053_p6 }
  0xc1   : > { %1061 = shalt.err (!%p1058_p11)  }
  0xc2   : > { %s1062_s8 = scalar_lea.vmem %s1682_s0, 16  ;;  %p1069_p1 = scmp.lt.s32.totalorder %s1682_s0, %s1559_s16 }
  0xc3   : > { %p1063_p12 = scmp.ne.s32.totalorder %s1682_s0, %s1062_s8  ;;  %p1070_p2 = scmp.lt.s32.totalorder %s1562_s25, %s1062_s8 }
  0xc5   : > { %p1064_p13 = pnand %p1063_p12, %p868_p3  ;;  %p1071_p4 = por %p1070_p2, %p1069_p1 }
  0xc7   : > { %p1065_p0 = pneg %p1064_p13 }
  0xc9   : > { %p1072_p5 = pnand %p1071_p4, %p1065_p0 }
  0xcb   : > { %1075 = shalt.err (!%p1072_p5)  }
  0xcc   : > { %830 = dma.hbm_to_vmem [thread:$0]  (%p868_p3), %s333_s12, 16, %s1682_s0, %s1542_s14 }
  0xcd   : > { %s683_s27 = scalar_lea.vmem %s1522_s21, 7 [#allocation2]  ;;  %s2114_s1 = smov (!%p868_p3, %s364_s1), 0 }
  0xce   : > { %s834_s22 = scalar_select %p868_p3, [#allocation5], [#allocation49] }
  0xcf   : > { %s779_s13 = sshll.u32 %s1692_s17, 4  ;;  %s377_s7 = sshll.u32 %s683_s27, 4  ;;  %s378_s7 = int_to_ptr.vmem [resolvable:$true] %s377_s7 }
  0xd0   : > { %s350_s20 = scalar_lea.hbm %s2046_s2, %s779_s13  ;;  %s1723_s26 = sld [smem:[%s834_s22 + %s2114_s1]] }
  0xd1   : > { %s1076_s23 = scalar_lea.hbm %s350_s20, 16  ;;  %p1081_p9 = scmp.lt.s32.totalorder %s350_s20, %s2046_s2 }
  0xd2   : > { %p1077_p6 = scmp.ne.s32.totalorder %s350_s20, %s1076_s23  ;;  %p1082_p11 = scmp.lt.s32.totalorder %s1549_s24, %s1076_s23 }
  0xd4   : > { %p1078_p7 = pnand %p1077_p6, %p868_p3  ;;  %p1083_p12 = por %p1082_p11, %p1081_p9 }
  0xd6   : > { %p1079_p8 = pneg %p1078_p7 }
  0xd8   : > { %p1084_p13 = pnand %p1083_p12, %p1079_p8 }
  0xda   : > { %1087 = shalt.err (!%p1084_p13)  }
  0xdb   : > { %s1088_s17 = scalar_lea.vmem %s361_s29, 16  ;;  %p1095_p4 = scmp.lt.s32.totalorder %s361_s29, %s1559_s16 }
  0xdc   : > { %p1089_p0 = scmp.ne.s32.totalorder %s361_s29, %s1088_s17  ;;  %p1096_p5 = scmp.lt.s32.totalorder %s1562_s25, %s1088_s17 }
  0xde   : > { %p1090_p1 = pnand %p1089_p0, %p868_p3  ;;  %p1097_p6 = por %p1096_p5, %p1095_p4 }
  0xe0   : > { %p1091_p2 = pneg %p1090_p1 }
  0xe2   : > { %p1098_p7 = pnand %p1097_p6, %p1091_p2 }
  0xe4   : > { %1101 = shalt.err (!%p1098_p7)  }
  0xe5   : > { %833 = dma.hbm_to_vmem [thread:$0]  (%p868_p3), %s350_s20, 16, %s361_s29, %s1542_s14 }
  0xe6   : > { %s381_s1 = sadd.s32 1, %s1470_s9  ;;  %s2061_s27 = ssub.s32 1, %s2100_s10 }
  0xe7   : > { %p1739_p8 = scmp.lt.s32.totalorder %s381_s1, 2  ;;  %s1745_s22 = sadd.s32 8, %s1512_s28 }
  0xe8   : > { %s781_s19 = sshll.u32 %s1723_s26, 4  ;;  %s786_s11 = sshll.u32 %s2061_s27, 3 }
  0xe9   : > { %s838_s13 = scalar_select %p1739_p8, [#allocation5], [#allocation50] }
  0xea   : > { %s367_s12 = scalar_lea.hbm %s2046_s2, %s781_s19 }
  0xeb   : > { %s1102_s29 = scalar_lea.hbm %s367_s12, 16  ;;  %p1107_p13 = scmp.lt.s32.totalorder %s367_s12, %s2046_s2 }
  0xec   : > { %p1103_p9 = scmp.ne.s32.totalorder %s367_s12, %s1102_s29  ;;  %p1108_p0 = scmp.lt.s32.totalorder %s1549_s24, %s1102_s29 }
  0xee   : > { %p1104_p11 = pnand %p1103_p9, %p868_p3  ;;  %p1109_p1 = por %p1108_p0, %p1107_p13 }
  0xf0   : > { %p1105_p12 = pneg %p1104_p11 }
  0xf2   : > { %p1110_p2 = pnand %p1109_p1, %p1105_p12 }
  0xf4   : > { %1113 = shalt.err (!%p1110_p2)  }
  0xf5   : > { %s1114_s28 = scalar_lea.vmem %s378_s7, 16  ;;  %p1121_p7 = scmp.lt.s32.totalorder %s378_s7, %s1559_s16 }
  0xf6   : > { %p1115_p4 = scmp.ne.s32.totalorder %s378_s7, %s1114_s28  ;;  %p1122_p10 = scmp.lt.s32.totalorder %s1562_s25, %s1114_s28 }
  0xf8   : > { %p1116_p5 = pnand %p1115_p4, %p868_p3  ;;  %p1123_p9 = por %p1122_p10, %p1121_p7 }
  0xfa   : > { %p1117_p6 = pneg %p1116_p5 }
  0xfc   : > { %p1124_p11 = pnand %p1123_p9, %p1117_p6 }
  0xfe   : > { %1127 = shalt.err (!%p1124_p11)  }
  0xff   : > { %836 = dma.hbm_to_vmem [thread:$0]  (%p868_p3), %s367_s12, 16, %s378_s7, %s1542_s14 }
 0x100   : > { %s839_s26 = scalar_select %p1739_p8, %s1745_s22, 0 }
 0x101   : > { %s1771_s1 = scalar_lea.vmem [#allocation2], %s786_s11  ;;  %s405_s0 = sadd.s32 1, %s1745_s22 }
 0x102   : > { %s401_s19 = sshll.u32 %s1771_s1, 4  ;;  %s388_s23 = sld [smem:[%s838_s13 + %s839_s26]]  ;;  %s1774_s19 = int_to_ptr.vmem [resolvable:$true] %s401_s19 }
 0x103   : > { %s693_s29 = scalar_lea.vmem %s1771_s1, 1 [#allocation2]  ;;  %s2116_s0 = smov (!%p1739_p8, %s405_s0), 0 }
 0x104   : > { %s841_s20 = scalar_select %p1739_p8, [#allocation5], [#allocation51] }
 0x105   : > { %s418_s7 = sshll.u32 %s693_s29, 4  ;;  %s422_s12 = sadd.s32 2, %s1745_s22  ;;  %s1785_s7 = int_to_ptr.vmem [resolvable:$true] %s418_s7 }
 0x106   : > { %s1783_s11 = sld [smem:[%s841_s20 + %s2116_s0]]  ;;  %s698_s28 = scalar_lea.vmem %s1771_s1, 2 [#allocation2] }
 0x107   : > { %s435_s6 = sshll.u32 %s698_s28, 4  ;;  %s2081_s5 = ssub.s32 1, %s2100_s10  ;;  %s1817_s6 = int_to_ptr.vmem [resolvable:$true] %s435_s6 }
 0x108   : > { %s785_s17 = sshll.u32 %s388_s23, 4  ;;  %s1793_s15 = scalar_lea.sflag [#allocation3], %s2081_s5 }
 0x109   : > { %s390_s26 = scalar_lea.hbm %s2046_s2, %s785_s17 }
 0x10a   : > { %s1128_s30 = scalar_lea.hbm %s390_s26, 16  ;;  %p1133_p13 = scmp.lt.s32.totalorder %s390_s26, %s2046_s2 }
 0x10b   : > { %p1129_p10 = scmp.ne.s32.totalorder %s390_s26, %s1128_s30  ;;  %p1134_p0 = scmp.lt.s32.totalorder %s1549_s24, %s1128_s30 }
 0x10d   : > { %p1130_p3 = pnand %p1129_p10, %p1739_p8  ;;  %p1135_p1 = por %p1134_p0, %p1133_p13 }
 0x10f   : > { %p1131_p12 = pneg %p1130_p3 }
 0x111   : > { %p1136_p2 = pnand %p1135_p1, %p1131_p12 }
 0x113   : > { %1139 = shalt.err (!%p1136_p2)  }
 0x114   : > { %s1140_s5 = scalar_lea.vmem %s1774_s19, 16  ;;  %p1147_p7 = scmp.lt.s32.totalorder %s1774_s19, %s1559_s16 }
 0x115   : > { %p1141_p4 = scmp.ne.s32.totalorder %s1774_s19, %s1140_s5  ;;  %p1148_p9 = scmp.lt.s32.totalorder %s1562_s25, %s1140_s5 }
 0x117   : > { %p1142_p5 = pnand %p1141_p4, %p1739_p8  ;;  %p1149_p11 = por %p1148_p9, %p1147_p7 }
 0x119   : > { %p1143_p6 = pneg %p1142_p5 }
 0x11b   : > { %p1150_p10 = pnand %p1149_p11, %p1143_p6 }
 0x11d   : > { %1153 = shalt.err (!%p1150_p10)  }
 0x11e   : > { %840 = dma.hbm_to_vmem [thread:$0]  (%p1739_p8), %s390_s26, 16, %s1774_s19, %s1793_s15 }
 0x11f   : > { %s844_s30 = scalar_select %p1739_p8, [#allocation5], [#allocation52] }
 0x120   : > { %s2118_s12 = smov (!%p1739_p8, %s422_s12), 0  ;;  %s787_s10 = sshll.u32 %s1783_s11, 4 }
 0x121   : > { %s408_s20 = scalar_lea.hbm %s2046_s2, %s787_s10  ;;  %s1822_s17 = sld [smem:[%s844_s30 + %s2118_s12]] }
 0x122   : > { %s1154_s28 = scalar_lea.hbm %s408_s20, 16  ;;  %p1159_p0 = scmp.lt.s32.totalorder %s408_s20, %s2046_s2 }
 0x123   : > { %p1155_p3 = scmp.ne.s32.totalorder %s408_s20, %s1154_s28  ;;  %p1160_p1 = scmp.lt.s32.totalorder %s1549_s24, %s1154_s28 }
 0x125   : > { %p1156_p12 = pnand %p1155_p3, %p1739_p8  ;;  %p1161_p2 = por %p1160_p1, %p1159_p0 }
 0x127   : > { %p1157_p13 = pneg %p1156_p12 }
 0x129   : > { %p1162_p4 = pnand %p1161_p2, %p1157_p13 }
 0x12b   : > { %1165 = shalt.err (!%p1162_p4)  }
 0x12c   : > { %s1166_s12 = scalar_lea.vmem %s1785_s7, 16  ;;  %p1173_p9 = scmp.lt.s32.totalorder %s1785_s7, %s1559_s16 }
 0x12d   : > { %p1167_p5 = scmp.ne.s32.totalorder %s1785_s7, %s1166_s12  ;;  %p1174_p11 = scmp.lt.s32.totalorder %s1562_s25, %s1166_s12 }
 0x12f   : > { %p1168_p6 = pnand %p1167_p5, %p1739_p8  ;;  %p1175_p10 = por %p1174_p11, %p1173_p9 }
 0x131   : > { %p1169_p7 = pneg %p1168_p6 }
 0x133   : > { %p1176_p3 = pnand %p1175_p10, %p1169_p7 }
 0x135   : > { %1179 = shalt.err (!%p1176_p3)  }
 0x136   : > { %843 = dma.hbm_to_vmem [thread:$0]  (%p1739_p8), %s408_s20, 16, %s1785_s7, %s1793_s15 }
 0x137   : > { %s439_s11 = sadd.s32 3, %s1745_s22  ;;  %s703_s26 = scalar_lea.vmem %s1771_s1, 3 [#allocation2] }
 0x138   : > { %s847_s29 = scalar_select %p1739_p8, [#allocation5], [#allocation53] }
 0x139   : > { %s2120_s11 = smov (!%p1739_p8, %s439_s11), 0  ;;  %s452_s0 = sshll.u32 %s703_s26, 4  ;;  %s1854_s0 = int_to_ptr.vmem [resolvable:$true] %s452_s0 }
 0x13a   : > { %s456_s5 = sadd.s32 4, %s1745_s22  ;;  %s789_s30 = sshll.u32 %s1822_s17, 4 }
 0x13b   : > { %s1849_s10 = sld [smem:[%s847_s29 + %s2120_s11]]  ;;  %s425_s28 = scalar_lea.hbm %s2046_s2, %s789_s30 }
 0x13c   : > { %s1180_s13 = scalar_lea.hbm %s425_s28, 16  ;;  %p1185_p1 = scmp.lt.s32.totalorder %s425_s28, %s2046_s2 }
 0x13d   : > { %p1181_p12 = scmp.ne.s32.totalorder %s425_s28, %s1180_s13  ;;  %p1186_p2 = scmp.lt.s32.totalorder %s1549_s24, %s1180_s13 }
 0x13f   : > { %p1182_p13 = pnand %p1181_p12, %p1739_p8  ;;  %p1187_p4 = por %p1186_p2, %p1185_p1 }
 0x141   : > { %p1183_p0 = pneg %p1182_p13 }
 0x143   : > { %p1188_p5 = pnand %p1187_p4, %p1183_p0 }
 0x145   : > { %1191 = shalt.err (!%p1188_p5)  }
 0x146   : > { %s1192_s17 = scalar_lea.vmem %s1817_s6, 16  ;;  %p1199_p11 = scmp.lt.s32.totalorder %s1817_s6, %s1559_s16 }
 0x147   : > { %p1193_p6 = scmp.ne.s32.totalorder %s1817_s6, %s1192_s17  ;;  %p1200_p10 = scmp.lt.s32.totalorder %s1562_s25, %s1192_s17 }
 0x149   : > { %p1194_p7 = pnand %p1193_p6, %p1739_p8  ;;  %p1201_p3 = por %p1200_p10, %p1199_p11 }
 0x14b   : > { %p1195_p9 = pneg %p1194_p7 }
 0x14d   : > { %p1202_p12 = pnand %p1201_p3, %p1195_p9 }
 0x14f   : > { %1205 = shalt.err (!%p1202_p12)  }
 0x150   : > { %846 = dma.hbm_to_vmem [thread:$0]  (%p1739_p8), %s425_s28, 16, %s1817_s6, %s1793_s15 }
 0x151   : > { %s850_s19 = scalar_select %p1739_p8, [#allocation5], [#allocation54] }
 0x152   : > { %s2122_s5 = smov (!%p1739_p8, %s456_s5), 0  ;;  %s708_s12 = scalar_lea.vmem %s1771_s1, 4 [#allocation2] }
 0x153   : > { %s473_s11 = sadd.s32 5, %s1745_s22  ;;  %s791_s26 = sshll.u32 %s1849_s10, 4 }
 0x154   : > { %s1880_s29 = sld [smem:[%s850_s19 + %s2122_s5]]  ;;  %s442_s23 = scalar_lea.hbm %s2046_s2, %s791_s26 }
 0x155   : > { %s469_s13 = sshll.u32 %s708_s12, 4  ;;  %s1206_s7 = scalar_lea.hbm %s442_s23, 16  ;;  %s470_s13 = int_to_ptr.vmem [resolvable:$true] %s469_s13 }
 0x156   : > { %p1207_p13 = scmp.ne.s32.totalorder %s442_s23, %s1206_s7  ;;  %p1211_p2 = scmp.lt.s32.totalorder %s442_s23, %s2046_s2 }
 0x157   : > { %p1212_p4 = scmp.lt.s32.totalorder %s1549_s24, %s1206_s7 }
 0x158   : > { %p1208_p0 = pnand %p1207_p13, %p1739_p8 }
 0x159   : > { %p1213_p5 = por %p1212_p4, %p1211_p2 }
 0x15a   : > { %p1209_p1 = pneg %p1208_p0 }
 0x15c   : > { %p1214_p6 = pnand %p1213_p5, %p1209_p1 }
 0x15e   : > { %1217 = shalt.err (!%p1214_p6)  }
 0x15f   : > { %s1218_s5 = scalar_lea.vmem %s1854_s0, 16  ;;  %p1225_p10 = scmp.lt.s32.totalorder %s1854_s0, %s1559_s16 }
 0x160   : > { %p1219_p7 = scmp.ne.s32.totalorder %s1854_s0, %s1218_s5  ;;  %p1226_p3 = scmp.lt.s32.totalorder %s1562_s25, %s1218_s5 }
 0x162   : > { %p1220_p9 = pnand %p1219_p7, %p1739_p8  ;;  %p1227_p12 = por %p1226_p3, %p1225_p10 }
 0x164   : > { %p1221_p11 = pneg %p1220_p9 }
 0x166   : > { %p1228_p13 = pnand %p1227_p12, %p1221_p11 }
 0x168   : > { %1231 = shalt.err (!%p1228_p13)  }
 0x169   : > { %849 = dma.hbm_to_vmem [thread:$0]  (%p1739_p8), %s442_s23, 16, %s1854_s0, %s1793_s15 }
 0x16a   : > { %s713_s10 = scalar_lea.vmem %s1771_s1, 5 [#allocation2]  ;;  %s2124_s11 = smov (!%p1739_p8, %s473_s11), 0 }
 0x16b   : > { %s853_s20 = scalar_select %p1739_p8, [#allocation5], [#allocation55] }
 0x16c   : > { %s793_s17 = sshll.u32 %s1880_s29, 4  ;;  %s486_s19 = sshll.u32 %s713_s10, 4  ;;  %s1926_s19 = int_to_ptr.vmem [resolvable:$true] %s486_s19 }
 0x16d   : > { %s459_s30 = scalar_lea.hbm %s2046_s2, %s793_s17  ;;  %s1911_s27 = sld [smem:[%s853_s20 + %s2124_s11]] }
 0x16e   : > { %s1232_s7 = scalar_lea.hbm %s459_s30, 16  ;;  %p1237_p4 = scmp.lt.s32.totalorder %s459_s30, %s2046_s2 }
 0x16f   : > { %p1233_p0 = scmp.ne.s32.totalorder %s459_s30, %s1232_s7  ;;  %p1238_p5 = scmp.lt.s32.totalorder %s1549_s24, %s1232_s7 }
 0x171   : > { %p1234_p1 = pnand %p1233_p0, %p1739_p8  ;;  %p1239_p6 = por %p1238_p5, %p1237_p4 }
 0x173   : > { %p1235_p2 = pneg %p1234_p1 }
 0x175   : > { %p1240_p7 = pnand %p1239_p6, %p1235_p2 }
 0x177   : > { %1243 = shalt.err (!%p1240_p7)  }
 0x178   : > { %s1244_s29 = scalar_lea.vmem %s470_s13, 16  ;;  %p1251_p3 = scmp.lt.s32.totalorder %s470_s13, %s1559_s16 }
 0x179   : > { %p1245_p9 = scmp.ne.s32.totalorder %s470_s13, %s1244_s29  ;;  %p1252_p12 = scmp.lt.s32.totalorder %s1562_s25, %s1244_s29 }
 0x17b   : > { %p1246_p11 = pnand %p1245_p9, %p1739_p8  ;;  %p1253_p13 = por %p1252_p12, %p1251_p3 }
 0x17d   : > { %p1247_p10 = pneg %p1246_p11 }
 0x17f   : > { %p1254_p0 = pnand %p1253_p13, %p1247_p10 }
 0x181   : > { %1257 = shalt.err (!%p1254_p0)  }
 0x182   : > { %852 = dma.hbm_to_vmem [thread:$0]  (%p1739_p8), %s459_s30, 16, %s470_s13, %s1793_s15 }
 0x183   : > { %s490_s11 = sadd.s32 6, %s1745_s22  ;;  %s718_s28 = scalar_lea.vmem %s1771_s1, 6 [#allocation2] }
 0x184   : > { %s856_s6 = scalar_select %p1739_p8, [#allocation5], [#allocation56] }
 0x185   : > { %s2126_s11 = smov (!%p1739_p8, %s490_s11), 0  ;;  %s507_s5 = sadd.s32 7, %s1745_s22 }
 0x186   : > { %s795_s10 = sshll.u32 %s1911_s27, 4  ;;  %s491_s20 = sld [smem:[%s856_s6 + %s2126_s11]] }
 0x187   : > { %s476_s26 = scalar_lea.hbm %s2046_s2, %s795_s10  ;;  %s503_s7 = sshll.u32 %s718_s28, 4  ;;  %s504_s7 = int_to_ptr.vmem [resolvable:$true] %s503_s7 }
 0x188   : > { %s1258_s0 = scalar_lea.hbm %s476_s26, 16  ;;  %p1263_p5 = scmp.lt.s32.totalorder %s476_s26, %s2046_s2 }
 0x189   : > { %p1259_p1 = scmp.ne.s32.totalorder %s476_s26, %s1258_s0  ;;  %p1264_p6 = scmp.lt.s32.totalorder %s1549_s24, %s1258_s0 }
 0x18b   : > { %p1260_p2 = pnand %p1259_p1, %p1739_p8  ;;  %p1265_p7 = por %p1264_p6, %p1263_p5 }
 0x18d   : > { %p1261_p4 = pneg %p1260_p2 }
 0x18f   : > { %p1266_p9 = pnand %p1265_p7, %p1261_p4 }
 0x191   : > { %1269 = shalt.err (!%p1266_p9)  }
 0x192   : > { %s1270_s22 = scalar_lea.vmem %s1926_s19, 16  ;;  %p1277_p12 = scmp.lt.s32.totalorder %s1926_s19, %s1559_s16 }
 0x193   : > { %p1271_p11 = scmp.ne.s32.totalorder %s1926_s19, %s1270_s22  ;;  %p1278_p13 = scmp.lt.s32.totalorder %s1562_s25, %s1270_s22 }
 0x195   : > { %p1272_p10 = pnand %p1271_p11, %p1739_p8  ;;  %p1279_p0 = por %p1278_p13, %p1277_p12 }
 0x197   : > { %p1273_p3 = pneg %p1272_p10 }
 0x199   : > { %p1280_p1 = pnand %p1279_p0, %p1273_p3 }
 0x19b   : > { %1283 = shalt.err (!%p1280_p1)  }
 0x19c   : > { %855 = dma.hbm_to_vmem [thread:$0]  (%p1739_p8), %s476_s26, 16, %s1926_s19, %s1793_s15  ;;  %v528_v3 = vlaneseq }
 0x19d   : > { %s859_s27 = scalar_select %p1739_p8, [#allocation5], [#allocation57] }
 0x19e   : > { %s2128_s5 = smov (!%p1739_p8, %s507_s5), 0  ;;  %s797_s23 = sshll.u32 %s491_s20, 4 }
 0x19f   : > { %s723_s29 = scalar_lea.vmem %s1771_s1, 7 [#allocation2]  ;;  %s493_s28 = scalar_lea.hbm %s2046_s2, %s797_s23 }
 0x1a0   : > { %s508_s10 = sld [smem:[%s859_s27 + %s2128_s5]]  ;;  %s1284_s17 = scalar_lea.hbm %s493_s28, 16 }
 0x1a1   : > { %p1285_p2 = scmp.ne.s32.totalorder %s493_s28, %s1284_s17  ;;  %p1289_p6 = scmp.lt.s32.totalorder %s493_s28, %s2046_s2 }
 0x1a2   : > { %p1290_p7 = scmp.lt.s32.totalorder %s1549_s24, %s1284_s17 }
 0x1a3   : > { %p1286_p4 = pnand %p1285_p2, %p1739_p8 }
 0x1a4   : > { %p1291_p9 = por %p1290_p7, %p1289_p6 }
 0x1a5   : > { %p1287_p5 = pneg %p1286_p4 }
 0x1a7   : > { %p1292_p11 = pnand %p1291_p9, %p1287_p5 }
 0x1a9   : > { %1295 = shalt.err (!%p1292_p11)  }
 0x1aa   : > { %s1296_s1 = scalar_lea.vmem %s504_s7, 16  ;;  %p1303_p13 = scmp.lt.s32.totalorder %s504_s7, %s1559_s16 }
 0x1ab   : > { %p1297_p10 = scmp.ne.s32.totalorder %s504_s7, %s1296_s1  ;;  %p1304_p0 = scmp.lt.s32.totalorder %s1562_s25, %s1296_s1 }
 0x1ad   : > { %p1298_p3 = pnand %p1297_p10, %p1739_p8  ;;  %p1305_p1 = por %p1304_p0, %p1303_p13 }
 0x1af   : > { %p1299_p12 = pneg %p1298_p3 }
 0x1b1   : > { %p1306_p2 = pnand %p1305_p1, %p1299_p12 }
 0x1b3   : > { %1309 = shalt.err (!%p1306_p2)  }
 0x1b4   : > { %858 = dma.hbm_to_vmem [thread:$0]  (%p1739_p8), %s493_s28, 16, %s504_s7, %s1793_s15  ;;  %v525_v4 = vld [vmem:[%s2048_s4] sm:$0x3]  ;;  %v529_v5 = vshrl.u32 %v528_v3, 7 }
 0x1b5   : > { %s520_s5 = sshll.u32 %s723_s29, 4  ;;  %s799_s0 = sshll.u32 %s508_s10, 4  ;;  %v534_v6 = vrot.slane %v525_v4, 7  ;;  %s521_s5 = int_to_ptr.vmem [resolvable:$true] %s520_s5 }
 0x1b6   : > { %s510_s22 = scalar_lea.hbm %s2046_s2, %s799_s0 }
 0x1b7   : > { %s1310_s27 = scalar_lea.hbm %s510_s22, 16  ;;  %p1315_p7 = scmp.lt.s32.totalorder %s510_s22, %s2046_s2 }
 0x1b8   : > { %p1311_p4 = scmp.ne.s32.totalorder %s510_s22, %s1310_s27  ;;  %p1316_p9 = scmp.lt.s32.totalorder %s1549_s24, %s1310_s27 }
 0x1ba   : > { %p1312_p5 = pnand %p1311_p4, %p1739_p8  ;;  %p1317_p11 = por %p1316_p9, %p1315_p7 }
 0x1bc   : > { %p1313_p6 = pneg %p1312_p5 }
 0x1be   : > { %p1318_p10 = pnand %p1317_p11, %p1313_p6 }
 0x1c0   : > { %1321 = shalt.err (!%p1318_p10)  }
 0x1c1   : > { %s1322_s29 = scalar_lea.vmem %s521_s5, 16  ;;  %p1329_p0 = scmp.lt.s32.totalorder %s521_s5, %s1559_s16 }
 0x1c2   : > { %p1323_p3 = scmp.ne.s32.totalorder %s521_s5, %s1322_s29  ;;  %p1330_p1 = scmp.lt.s32.totalorder %s1562_s25, %s1322_s29 }
 0x1c4   : > { %p1324_p12 = pnand %p1323_p3, %p1739_p8  ;;  %p1331_p2 = por %p1330_p1, %p1329_p0 }
 0x1c6   : > { %p1325_p13 = pneg %p1324_p12 }
 0x1c8   : > { %p1332_p4 = pnand %p1331_p2, %p1325_p13 }
 0x1ca   : > { %1335 = shalt.err (!%p1332_p4)  }
 0x1cb   : > { %861 = dma.hbm_to_vmem [thread:$0]  (%p1739_p8), %s510_s22, 16, %s521_s5, %s1793_s15  ;;  %v530_v7 = vsub.s32 0, %v529_v5  ;;  %v536_v8 = vsub.f32 %v525_v4, %v534_v6  ;;  %v544_v9 = vsub.s32 1, %v529_v5  ;;  %v524_v11 = vld [vmem:[%s2047_s3] sm:$0xff]  ;;  %v540_v14 = vpop.permute.xlu0 %539 }
 0x1cc   : > { %s223_s16 = scalar_lea.vmem [#allocation6], %s1501_s18 }
 0x1cd   : > { %v531_v10 = vrot.slane %v525_v4, %v530_v7  ;;  %v545_v12 = vrot.slane %v536_v8, %v544_v9 }
 0x1cf   : > { %v532_v13 = vadd.f32 %v531_v10, %v524_v11  ;;  %v546_v15 = vmul.f32 %v545_v12, %v540_v14 }
 0x1d1   : > { %v547_v16 = vadd.f32 %v546_v15, %v532_v13 }
 0x1d2   : > { %1380 = dma.done.wait %s1542_s14, 128 }
 0x1d3   : > { %1381 = vsyncadd %s1542_s14, 4294967168  ;;  %v554_v17 = vld [vmem:[%s1522_s21] sm:$0xff]  ;;  %s2082_s15 = sld [smem:[#allocation62_spill]]  ;;  %s805_s10 = sshll.u32 %s1470_s9, 7 }
 0x1d4   : > { %v555_v18 = vadd.f32 %v554_v17, %v547_v16  ;;  %s2083_s18 = sld [smem:[#allocation67_spill]]  ;;  %s601_s17 = sshll.u32 %s223_s16, 4  ;;  %s602_s17 = int_to_ptr.vmem [resolvable:$true] %s601_s17 }
 0x1d5   : > { %s2084_s25 = sld [smem:[#allocation70_spill]]  ;;  %s1336_s0 = scalar_lea.vmem %s602_s17, 128 }
 0x1d6   : > { %556 = vadd.xlane.f32.xlu0 %v555_v18  ;;  %v558_v19 = vmul.f32 %v555_v18, %v555_v18  ;;  %s2085_s28 = sld [smem:[#allocation71_spill]]  ;;  %p1337_p8 = scmp.ne.s32.totalorder %s602_s17, %s1336_s0 }
 0x1d7   : > { %s2086_s1 = sld [smem:[#allocation72_spill]]  ;;  %s1405_s13 = smov [#allocation6]  }
 0x1d8   : > { %s1340_s30 = sshll.u32 %s1405_s13, 4  ;;  %s1341_s30 = int_to_ptr.vmem [resolvable:$false] %s1340_s30 }
 0x1d9   : > { %s2087_s20 = sand.u32 1, %s2082_s15   ;;  %s1342_s9 = scalar_lea.vmem %s1341_s30, 256 }
 0x1da   : > { %559 = vadd.xlane.f32.xlu0 %v558_v19  ;;  %s588_s26 = scalar_lea.sflag [#allocation7], %s2087_s20  ;;  %p2088_p5 = scmp.ne.s32.totalorder %s2083_s18, 0 }
 0x1db   : > { %v802_v30 = vld [vmem:[%s2084_s25] ss:$0 sm:$0xff]  ;;  %p1343_p9 = scmp.lt.s32.totalorder %s602_s17, %s1341_s30  ;;  %p1344_p11 = scmp.lt.s32.totalorder %s1342_s9, %s1336_s0 }
 0x1dc   : > { %v803_v32 = vld [vmem:[%s2085_s28] ss:$0 sm:$0xff]  ;;  %p1338_p6 = pnand %p1337_p8, %p2088_p5 }
 0x1dd   : > { %s599_s5 = scalar_lea.hbm %s2086_s1, %s805_s10  ;;  %p1345_p10 = por %p1344_p11, %p1343_p9 }
 0x1de   : > { %p1339_p7 = pneg %p1338_p6 }
 0x1e0   : > { %p1346_p3 = pnand %p1345_p10, %p1339_p7 }
 0x25f   : > { %v557_v20 = vpop.xlane.xlu0 %556 }
 0x260   : > { %v561_v21 = vmul.f32 0.0078125, %v557_v20 }
 0x262   : > { %v563_v23 = vmul.f32 %v561_v21, %v561_v21  ;;  %v568_v28 = vsub.f32 %v555_v18, %v561_v21 }
 0x263   : > { %v560_v22 = vpop.xlane.xlu0 %559 }
 0x264   : > { %v562_v24 = vmul.f32 0.0078125, %v560_v22 }
 0x266   : > { %v564_v25 = vsub.f32 %v562_v24, %v563_v23 }
 0x268   : > { %v565_v26 = vmax.f32 %v564_v25, 0.0 }
 0x26a   : > { %v566_v27 = vadd.f32 1e-12, %v565_v26 }
 0x26c   : > { %906 = vrsqrt.f32 %v566_v27 }
 0x279   : > { %v907_v29 = vpop.eup %906 }
 0x27a   : > { %v569_v31 = vmul.f32 %v907_v29, %v568_v28 }
 0x27c   : > { %v577_v33 = vmul.f32 %v802_v30, %v569_v31 }
 0x27e   : > { %v585_v34 = vadd.f32 %v803_v32, %v577_v33 }
 0x280   : > { %586 = vst [vmem:[%s223_s16] sm:$0xff] %v585_v34 }
 0x281   : > { %1349 = shalt.err (!%p1346_p3)
}
 0x282   : > { %s1350_s22 = scalar_lea.hbm %s599_s5, 128  ;;  %s1354_s7 = scalar_lea.hbm %s2086_s1, 256 }
 0x283   : > { %p1351_p12 = scmp.ne.s32.totalorder %s599_s5, %s1350_s22  ;;  %p1355_p1 = scmp.lt.s32.totalorder %s599_s5, %s2086_s1 }
 0x284   : > { %p1356_p2 = scmp.lt.s32.totalorder %s1354_s7, %s1350_s22 }
 0x285   : > { %p1352_p13 = pnand %p1351_p12, %p2088_p5 }
 0x286   : > { %p1357_p4 = por %p1356_p2, %p1355_p1 }
 0x287   : > { %p1353_p0 = pneg %p1352_p13 }
 0x289   : > { %p1358_p8 = pnand %p1357_p4, %p1353_p0 }
 0x28b   : > { %1361 = shalt.err (!%p1358_p8)
}
 0x28c   : > { %862 = dma.vmem_to_hbm [thread:$0]  (%p2088_p5), %s602_s17, 128, %s599_s5, %s588_s26  }
 0x28d PF: > { %s2089_s11 = sld [smem:[#allocation64_spill]] }
 0x28e   : > { %s2090_s16 = sld [smem:[#allocation61_spill]] }
 0x28f   : > { %s2091_s15 = sld [smem:[#allocation68_spill]] }
 0x293   : > { %p870_p6 = scmp.ge.s32.totalorder %s2089_s11, 2 }
 0x294   : > { %s613_s14 = sand.u32 1, %s2090_s16  }
 0x295   : > { %p2092_p7 = scmp.ne.s32.totalorder %s2091_s15, 0  ;;  %s614_s21 = scalar_lea.sflag [#allocation7], %s613_s14 }
 0x297   : > { %p865_p9 = pnand %p870_p6, %p2092_p7 }
 0x299   : > { %p866_p11 = pneg %p865_p9 }
 0x29b   : > { %1383 = dma.done.wait (%p866_p11), %s614_s21, 128  }
 0x29c   : > { %1385 = vsyncadd (%p866_p11), %s614_s21, 4294967168  ;;  %s2093_s8 = sld [smem:[#allocation65_spill]] }
 0x29d   : > { %s2094_s29 = sld [smem:[#allocation62_spill]] }
 0x29e   : > { %s2095_s30 = sld [smem:[#allocation63_spill]] }
 0x29f   : > { %s2096_s0 = sld [smem:[#allocation66_spill]] }
 0x2a2   : > { %p23_p10 = scmp.ge.s32.totalorder %s2093_s8, 4  }
 0x2a4   :  { %25 = sbr.rel (!%p23_p10) target bundleno = 20 (0x14), region = 184 }
 0x2a9   :  { %619 = vsyncpa [#allocation7], 1 }
 0x2aa   :  { %621 = vsyncpa [#allocation7 + $0x1], 1 }
 0x2ab   :  { %622 = vsyncmov [#allocation3] }
 0x2ae   :  { %s623_s18 = vpop.sfrf %622 }
 0x2af   :  { %p808_p5 = scmp.ne.s32.totalorder %s623_s18, 0 }
 0x2b1   :  { %627 = shalt.err (%p808_p5)  }
 0x2b2   :  { %629 = vsyncmov [#allocation3 + $0x1] }
 0x2b5   :  { %s630_s25 = vpop.sfrf %629 }
 0x2b6   :  { %p809_p3 = scmp.ne.s32.totalorder %s630_s25, 0 }
 0x2b8   :  { %634 = shalt.err (%p809_p3)  }

</bundles_post_ra>
